<compile_context>
chip_gen: v7x
topology: tpu7x:2x2x1
jax: 0.10.0
libtpu: 0.0.40
codegen_flags: <defaults>
</compile_context>

<pallas_src>
import functools

import jax
import jax.numpy as jnp
from jax.experimental import pallas as pl
from jax.experimental.pallas import tpu as pltpu

HIDDEN_MID = 1024  # fixed inner width from the module


def _round_up(x, m):
    return ((x + m - 1) // m) * m


def _q_kernel(x_ref, w1_ref, b1_ref, w2_ref, b2_ref, o_ref, h_ref):
    # x_ref : (bb, H)           bf16 batch tile
    # w1_ref: (H, 1024)         bf16, constant across grid (fetched once)
    # b1_ref: (1, 1024)         f32
    # w2_ref: (1024, bv)        bf16 V-tile
    # b2_ref: (1, bv)           f32
    # o_ref : (bb, bv)          f32 output tile (lane-dense, bv % 128 == 0)
    # h_ref : (bb, 1024)        bf16 VMEM scratch, carried across the V axis

    # First projection: compute once per batch tile (j == 0), reuse for the
    # remaining V tiles of the same batch tile (grid order: j innermost,
    # V axis is "arbitrary" so the scratch carry is well-defined).
    @pl.when(pl.program_id(1) == 0)
    def _():
        h = jnp.dot(x_ref[...], w1_ref[...],
                    preferred_element_type=jnp.float32) + b1_ref[...]
        h_ref[...] = h.astype(h_ref.dtype)

    logits = jnp.dot(h_ref[...], w2_ref[...],
                     preferred_element_type=jnp.float32) + b2_ref[...]
    o_ref[...] = jax.nn.sigmoid(logits).astype(o_ref.dtype)


@functools.partial(jax.jit, static_argnames=("block_b", "block_v"))
def q_model_forward(x, w1, b1, w2, b2, *, block_b=256, block_v=512):
    """sigmoid((x @ w1.T + b1) @ w2.T + b2).

    x : (B, H) f32;  w1: (1024, H);  b1: (1024,);  w2: (V, 1024);  b2: (V,)
    (weights/biases in nn.Linear layout). Returns (B, V) f32.
    """
    assert block_b % 16 == 0, "block_b must be a multiple of 16 (bf16 sublanes)"
    B, H = x.shape
    V = w2.shape[0]

    # ---- static tile-size selection -------------------------------------
    # Batch tile: large MXU-friendly tile, clamped for tiny demo batches.
    bb = min(block_b, _round_up(max(B, 1), 128))
    B_pad = _round_up(B, bb)
    # Output tile: V padded to a lane-dense multiple of 128, tiled in <=512.
    V_pad = _round_up(V, 128)
    bv = 128
    for cand in (512, 384, 256, 128):
        if cand <= max(block_v, 128) and V_pad % cand == 0:
            bv = cand
            break

    # ---- dtype / layout prep: bf16 operands, f32 bias & epilogue ---------
    x_p = jnp.pad(x.astype(jnp.bfloat16), ((0, B_pad - B), (0, 0)))
    w1_t = w1.T.astype(jnp.bfloat16)                                  # (H, 1024)
    w2_t = jnp.pad(w2.T.astype(jnp.bfloat16), ((0, 0), (0, V_pad - V)))
    b1_r = b1.astype(jnp.float32).reshape(1, HIDDEN_MID)
    b2_r = jnp.pad(b2.astype(jnp.float32), (0, V_pad - V)).reshape(1, V_pad)

    grid = (B_pad // bb, V_pad // bv)

    flops = 2 * B_pad * (H * HIDDEN_MID + HIDDEN_MID * V_pad)
    bytes_accessed = (x_p.size * 2 + w1_t.size * 2 + w2_t.size * 2
                      + b1_r.size * 4 + b2_r.size * 4 + B_pad * V_pad * 4)
    cost = pl.CostEstimate(flops=int(flops),
                           transcendentals=int(B_pad * V_pad),
                           bytes_accessed=int(bytes_accessed))

    out = pl.pallas_call(
        _q_kernel,
        out_shape=jax.ShapeDtypeStruct((B_pad, V_pad), jnp.float32),
        grid_spec=pltpu.PrefetchScalarGridSpec(
            num_scalar_prefetch=0,
            grid=grid,
            in_specs=[
                pl.BlockSpec((bb, H), lambda i, j: (i, 0)),             # x tile
                pl.BlockSpec((H, HIDDEN_MID), lambda i, j: (0, 0)),     # W1^T
                pl.BlockSpec((1, HIDDEN_MID), lambda i, j: (0, 0)),     # b1
                pl.BlockSpec((HIDDEN_MID, bv), lambda i, j: (0, j)),    # W2^T tile
                pl.BlockSpec((1, bv), lambda i, j: (0, j)),             # b2 tile
            ],
            out_specs=pl.BlockSpec((bb, bv), lambda i, j: (i, j)),
            scratch_shapes=[pltpu.VMEM((bb, HIDDEN_MID), jnp.bfloat16)],
        ),
        compiler_params=pltpu.CompilerParams(
            dimension_semantics=("parallel", "arbitrary"),
            vmem_limit_bytes=48 * 1024 * 1024,
        ),
        cost_estimate=cost,
    )(x_p, w1_t, b1_r, w2_t, b2_r)

    return out[:B, :V]


if __name__ == "__main__":
    # Small shapes consistent with the module's forward: X is (batch, hidden).
    batch, hidden_size, voc_class = 8, 32, 16

    key = jax.random.PRNGKey(0)
    kx, k1, kb1, k2, kb2 = jax.random.split(key, 5)

    x = jax.random.normal(kx, (batch, hidden_size), dtype=jnp.float32)

    # Deterministic parameter init (shapes mirror nn.Linear's weight/bias).
    w1 = jax.random.normal(k1, (HIDDEN_MID, hidden_size), jnp.float32) * 0.05
    b1 = jax.random.normal(kb1, (HIDDEN_MID,), jnp.float32) * 0.05
    w2 = jax.random.normal(k2, (voc_class, HIDDEN_MID), jnp.float32) * 0.05
    b2 = jax.random.normal(kb2, (voc_class,), jnp.float32) * 0.05

    out = q_model_forward(x, w1, b1, w2, b2)
    out = jax.block_until_ready(out)
    assert out.shape == (batch, voc_class)

    # Reference 1: same bf16-operand / f32-accumulate path as the kernel.
    xb = x.astype(jnp.bfloat16)
    w1b = w1.T.astype(jnp.bfloat16)
    w2b = w2.T.astype(jnp.bfloat16)
    h = jnp.dot(xb, w1b, preferred_element_type=jnp.float32) + b1
    h = h.astype(jnp.bfloat16)
    ref_bf16 = jax.nn.sigmoid(
        jnp.dot(h, w2b, preferred_element_type=jnp.float32) + b2)

    # Reference 2: pure-f32 math of the PyTorch module (looser tolerance
    # because the kernel's matmul operands are bf16).
    ref_f32 = jax.nn.sigmoid((x @ w1.T + b1) @ w2.T + b2)

    assert jnp.allclose(out, ref_bf16, atol=2e-3), "mismatch vs bf16 reference"
    assert jnp.allclose(out, ref_f32, atol=2e-2), "mismatch vs f32 reference"

    print("KERNEL_OK")
</pallas_src>

<mosaic_0001>
module attributes {stable_mosaic.version = 11 : i64} {
  func.func @_q_kernel(%arg0: i32, %arg1: i32, %arg2: memref<128x32xbf16, #tpu.memory_space<vmem>>, %arg3: memref<32x1024xbf16, #tpu.memory_space<vmem>>, %arg4: memref<1x1024xf32, #tpu.memory_space<vmem>>, %arg5: memref<1024x128xbf16, #tpu.memory_space<vmem>>, %arg6: memref<1x128xf32, #tpu.memory_space<vmem>>, %arg7: memref<128x128xf32, #tpu.memory_space<vmem>>, %arg8: memref<128x1024xbf16, #tpu.memory_space<vmem>>) attributes {dimension_semantics = [#tpu.dimension_semantics<parallel>, #tpu.dimension_semantics<arbitrary>], iteration_bounds = array<i64: 1, 1>, scalar_prefetch = 0 : i64, scratch_operands = 1 : i64, tpu.core_type = #tpu.core_type<tc>, window_params = [{transform_indices = @transform_0, window_bounds = array<i64: 128, 32>}, {pipeline_mode = #tpu.pipeline_mode<synchronous>, transform_indices = @transform_1, window_bounds = array<i64: 32, 1024>}, {pipeline_mode = #tpu.pipeline_mode<synchronous>, transform_indices = @transform_2, window_bounds = array<i64: 1, 1024>}, {transform_indices = @transform_3, window_bounds = array<i64: 1024, 128>}, {transform_indices = @transform_4, window_bounds = array<i64: 1, 128>}, {transform_indices = @transform_5, window_bounds = array<i64: 128, 128>}]} {
    %c0_i32 = arith.constant 0 : i32
    %0 = arith.cmpi eq, %arg1, %c0_i32 : i32
    %1 = arith.extui %0 : i1 to i32
    %c0_i32_0 = arith.constant 0 : i32
    %2 = arith.cmpi ne, %1, %c0_i32_0 : i32
    scf.if %2 {
      %c0_9 = arith.constant 0 : index
      %c0_10 = arith.constant 0 : index
      %15 = vector.load %arg2[%c0_9, %c0_10] : memref<128x32xbf16, #tpu.memory_space<vmem>>, vector<128x32xbf16>
      %c0_11 = arith.constant 0 : index
      %c0_12 = arith.constant 0 : index
      %16 = vector.load %arg3[%c0_11, %c0_12] : memref<32x1024xbf16, #tpu.memory_space<vmem>>, vector<32x1024xbf16>
      %cst_13 = arith.constant dense<0.000000e+00> : vector<128x1024xf32>
      %17 = tpu.matmul %15, %16, %cst_13 {dimension_numbers = #tpu.dot_dimension_numbers<[1], [0], [0], [1], [0, 0, 1, 1], [], []>} : vector<128x32xbf16>, vector<32x1024xbf16>, vector<128x1024xf32> -> vector<128x1024xf32>
      %c0_14 = arith.constant 0 : index
      %c0_15 = arith.constant 0 : index
      %18 = vector.load %arg4[%c0_14, %c0_15] : memref<1x1024xf32, #tpu.memory_space<vmem>>, vector<1x1024xf32>
      %19 = vector.broadcast %18 : vector<1x1024xf32> to vector<128x1024xf32>
      %20 = arith.addf %17, %19 : vector<128x1024xf32>
      %21 = arith.truncf %20 : vector<128x1024xf32> to vector<128x1024xbf16>
      %c0_16 = arith.constant 0 : index
      %c0_17 = arith.constant 0 : index
      %22 = vector.load %arg8[%c0_16, %c0_17] : memref<128x1024xbf16, #tpu.memory_space<vmem>>, vector<128x1024xbf16>
      tpu.vector_store %arg8[%c0_16, %c0_17], %21 {strides = array<i32>} : memref<128x1024xbf16, #tpu.memory_space<vmem>>, vector<128x1024xbf16>,
    } else {
    }
    %c0 = arith.constant 0 : index
    %c0_1 = arith.constant 0 : index
    %3 = vector.load %arg8[%c0, %c0_1] : memref<128x1024xbf16, #tpu.memory_space<vmem>>, vector<128x1024xbf16>
    %c0_2 = arith.constant 0 : index
    %c0_3 = arith.constant 0 : index
    %4 = vector.load %arg5[%c0_2, %c0_3] : memref<1024x128xbf16, #tpu.memory_space<vmem>>, vector<1024x128xbf16>
    %cst = arith.constant dense<0.000000e+00> : vector<128x128xf32>
    %5 = tpu.matmul %3, %4, %cst {dimension_numbers = #tpu.dot_dimension_numbers<[1], [0], [0], [1], [0, 0, 1, 1], [], []>} : vector<128x1024xbf16>, vector<1024x128xbf16>, vector<128x128xf32> -> vector<128x128xf32>
    %c0_4 = arith.constant 0 : index
    %c0_5 = arith.constant 0 : index
    %6 = vector.load %arg6[%c0_4, %c0_5] : memref<1x128xf32, #tpu.memory_space<vmem>>, vector<1x128xf32>
    %7 = vector.broadcast %6 : vector<1x128xf32> to vector<128x128xf32>
    %8 = arith.addf %5, %7 : vector<128x128xf32>
    %9 = arith.negf %8 : vector<128x128xf32>
    %10 = math.exp %9 : vector<128x128xf32>
    %cst_6 = arith.constant 1.000000e+00 : f32
    %11 = vector.broadcast %cst_6 : f32 to vector<128x128xf32>
    %12 = arith.addf %11, %10 : vector<128x128xf32>
    %13 = arith.divf %11, %12 : vector<128x128xf32>
    %c0_7 = arith.constant 0 : index
    %c0_8 = arith.constant 0 : index
    %14 = vector.load %arg7[%c0_7, %c0_8] : memref<128x128xf32, #tpu.memory_space<vmem>>, vector<128x128xf32>
    tpu.vector_store %arg7[%c0_7, %c0_8], %13 {strides = array<i32>} : memref<128x128xf32, #tpu.memory_space<vmem>>, vector<128x128xf32>,
    return
  }
  func.func @transform_0(%arg0: i32, %arg1: i32) -> (i32, i32) {
    %c0_i32 = arith.constant 0 : i32
    %c0_i32_0 = arith.constant 0 : i32
    return %arg0, %c0_i32 : i32, i32
  }
  func.func @transform_1(%arg0: i32, %arg1: i32) -> (i32, i32) {
    %c0_i32 = arith.constant 0 : i32
    %c0_i32_0 = arith.constant 0 : i32
    %c0_i32_1 = arith.constant 0 : i32
    return %c0_i32, %c0_i32_0 : i32, i32
  }
  func.func @transform_2(%arg0: i32, %arg1: i32) -> (i32, i32) {
    %c0_i32 = arith.constant 0 : i32
    %c0_i32_0 = arith.constant 0 : i32
    %c0_i32_1 = arith.constant 0 : i32
    return %c0_i32, %c0_i32_0 : i32, i32
  }
  func.func @transform_3(%arg0: i32, %arg1: i32) -> (i32, i32) {
    %c0_i32 = arith.constant 0 : i32
    %c0_i32_0 = arith.constant 0 : i32
    return %c0_i32, %arg1 : i32, i32
  }
  func.func @transform_4(%arg0: i32, %arg1: i32) -> (i32, i32) {
    %c0_i32 = arith.constant 0 : i32
    %c0_i32_0 = arith.constant 0 : i32
    return %c0_i32, %arg1 : i32, i32
  }
  func.func @transform_5(%arg0: i32, %arg1: i32) -> (i32, i32) {
    %c0_i32 = arith.constant 0 : i32
    return %arg0, %arg1 : i32, i32
  }
}

</mosaic_0001>

<bundles_post_ra>
// kernel: q_model_forward.1
= control target key start
LH: loop header
LB: loop body
LE: loop exit
PB: predicated region body
PF: predicated region fallthrough
CT: control target
= control target key end

     0   :  { %v2441_v3 = vmov 0   ;;  %vm219_vm0 = vcmask 261120   ;;  %s3132_s1 = inlined_call_operand.vmem [shape: bf16[32,1024], index: 1, kind: input, shape index: {}]   ;;  %s3133_s0 = inlined_call_operand.vmem [shape: bf16[128,32], index: 0, kind: input, shape index: {}]   ;;  %s3134_s3 = inlined_call_operand.vmem [shape: bf16[1024,128], index: 3, kind: input, shape index: {}]   ;;  %s3135_s2 = inlined_call_operand.vmem [shape: f32[1,1024], index: 2, kind: input, shape index: {}]   ;;  %s3136_s4 = inlined_call_operand.vmem [shape: f32[1,128], index: 4, kind: input, shape index: {}]   ;;  %s3137_s5 = inlined_call_operand.vmem [shape: f32[128,128], index: 5, kind: output, shape index: {}]  }
   0x1   :  { %v41_v0 = vld [vmem:[%s3132_s1] sm:$0xff]  ;;  %v42_v2 = vld [vmem:[%s3132_s1 + $0x8] sm:$0xff]  ;;  %276 = vmatprep.mubr.bf16.mxu0 %v2441_v3  ;;  %389 = vmatprep.mubr.bf16.mxu1 %v2441_v3  ;;  %v43_v15 = vld [vmem:[%s3132_s1 + $0x10] sm:$0xff] }
   0x2   :  { %v45_v1 = vld [vmem:[%s3132_s1 + $0x20] sm:$0xff]  ;;  %v46_v5 = vld [vmem:[%s3132_s1 + $0x28] sm:$0xff]  ;;  %v47_v17 = vld [vmem:[%s3132_s1 + $0x30] sm:$0xff] }
   0x3   :  { %v1920_v4 = vcombine.high %v41_v0, %v45_v1  ;;  %v1919_v6 = vcombine.low %v41_v0, %v45_v1  ;;  %v49_v7 = vld [vmem:[%s3132_s1 + $0x40] sm:$0xff]  ;;  %v1922_v9 = vcombine.high %v42_v2, %v46_v5  ;;  %v1921_v10 = vcombine.low %v42_v2, %v46_v5  ;;  %v50_v12 = vld [vmem:[%s3132_s1 + $0x48] sm:$0xff]  ;;  %v44_v18 = vld [vmem:[%s3132_s1 + $0x18] sm:$0xff] }
   0x4   :  { %v53_v8 = vld [vmem:[%s3132_s1 + $0x60] sm:$0xff]  ;;  %v54_v13 = vld [vmem:[%s3132_s1 + $0x68] sm:$0xff]  ;;  %v48_v19 = vld [vmem:[%s3132_s1 + $0x38] sm:$0xff]  ;;  %v1924_v21 = vcombine.high %v43_v15, %v47_v17  ;;  %v1923_v24 = vcombine.low %v43_v15, %v47_v17 }
   0x5   :  { %v1928_v11 = vcombine.high %v49_v7, %v53_v8  ;;  %244 = vmatprep.subr.bf16.mxu0 %v1920_v4  ;;  %v1930_v14 = vcombine.high %v50_v12, %v54_v13  ;;  %357 = vmatprep.subr.bf16.mxu1 %v1922_v9  ;;  %v1927_v16 = vcombine.low %v49_v7, %v53_v8  ;;  %v2513_v23 = vld [vmem:[%s3133_s0] sm:$0xff]   ;;  %v51_v26 = vld [vmem:[%s3132_s1 + $0x50] sm:$0xff]  ;;  %v52_v28 = vld [vmem:[%s3132_s1 + $0x58] sm:$0xff] }
   0x6   :  { %245 = vmatpush1.bf16.msra.mxu0 %v1919_v6  ;;  %358 = vmatpush1.bf16.msra.mxu1 %v1921_v10  ;;  %v1929_v20 = vcombine.low %v50_v12, %v54_v13  ;;  %v1926_v22 = vcombine.high %v44_v18, %v48_v19  ;;  %v1925_v25 = vcombine.low %v44_v18, %v48_v19  ;;  %v55_v27 = vld [vmem:[%s3132_s1 + $0x70] sm:$0xff]  ;;  %v56_v30 = vld [vmem:[%s3132_s1 + $0x78] sm:$0xff]  ;;  %v2313_v34 = vld [vmem:[%s3134_s3 + $0x40] sm:$0xff]   ;;  %v59_v12 = vlaneseq }
   0x7   :  { %246 = vmatprep.subr.bf16.mxu0 %v1928_v11  ;;  %359 = vmatprep.subr.bf16.mxu1 %v1930_v14  ;;  %v1932_v29 = vcombine.high %v51_v26, %v55_v27  ;;  %v1934_v31 = vcombine.high %v52_v28, %v56_v30  ;;  %v1931_v32 = vcombine.low %v51_v26, %v55_v27  ;;  %v2539_v35 = vld [vmem:[%s3133_s0 + $0x8] sm:$0xff]   ;;  %v2315_v36 = vld [vmem:[%s3134_s3 + $0xc0] sm:$0xff]   ;;  %v2553_v37 = vld [vmem:[%s3133_s0 + $0x10] sm:$0xff]  }
   0x8   :  { %v1933_v33 = vcombine.low %v52_v28, %v56_v30  ;;  %v2564_v38 = vld [vmem:[%s3133_s0 + $0x18] sm:$0xff]   ;;  %v2575_v39 = vld [vmem:[%s3133_s0 + $0x20] sm:$0xff]   ;;  %v2586_v40 = vld [vmem:[%s3133_s0 + $0x28] sm:$0xff]   ;;  %v2758_v13 = vshrl.u32 %v59_v12, 7 }
   0x9   :  { %v2597_v41 = vld [vmem:[%s3133_s0 + $0x30] sm:$0xff]   ;;  %v2608_v42 = vld [vmem:[%s3133_s0 + $0x38] sm:$0xff]   ;;  %v2314_v43 = vld [vmem:[%s3134_s3] sm:$0xff]  }
   0xa   :  { %247 = vmatpush1.bf16.msra.mxu0 %v1927_v16  ;;  %360 = vmatpush1.bf16.msra.mxu1 %v1929_v20  ;;  %v2316_v44 = vld [vmem:[%s3134_s3 + $0x80] sm:$0xff]   ;;  %v2317_v45 = vld [vmem:[%s3134_s3 + $0x48] sm:$0xff]   ;;  %v2321_v49 = vld [vmem:[%s3134_s3 + $0x50] sm:$0xff]   ;;  %v69_v14 = vsub.s32 2, %v2758_v13  ;;  %v61_v15 = vsub.s32 0, %v2758_v13  ;;  %v73_v16 = vsub.s32 3, %v2758_v13 }
   0xb   :  { %470 = vmatprep.subr.bf16.mxu0 %v1924_v21  ;;  %583 = vmatprep.subr.bf16.mxu1 %v1926_v22  ;;  %v2319_v46 = vld [vmem:[%s3134_s3 + $0xc8] sm:$0xff]   ;;  %v2323_v50 = vld [vmem:[%s3134_s3 + $0xd0] sm:$0xff]   ;;  %v2325_v53 = vld [vmem:[%s3134_s3 + $0x58] sm:$0xff]  }
   0xc   :  { %v2318_v47 = vld [vmem:[%s3134_s3 + $0x8] sm:$0xff]   ;;  %v2322_v51 = vld [vmem:[%s3134_s3 + $0x10] sm:$0xff]   ;;  %v2327_v54 = vld [vmem:[%s3134_s3 + $0xd8] sm:$0xff]  }
   0xd   :  { %1935 = vmatmul.mubr.msk.bf16.vlgmr.msra.gmra.mrb[0].mxu0 %vm219_vm0, %v2513_v23  ;;  %1943 = vmatmul.mubr.msk.bf16.vlgmr.msra.gmra.mrb[0].mxu1 %vm219_vm0, %v2513_v23  ;;  %v2320_v48 = vld [vmem:[%s3134_s3 + $0x88] sm:$0xff]   ;;  %v2324_v52 = vld [vmem:[%s3134_s3 + $0x90] sm:$0xff]   ;;  %v2326_v55 = vld [vmem:[%s3134_s3 + $0x18] sm:$0xff]  }
   0xe   :  { %471 = vmatpush1.bf16.msra.mxu0 %v1923_v24  ;;  %584 = vmatpush1.bf16.msra.mxu1 %v1925_v25  ;;  %v2328_v56 = vld [vmem:[%s3134_s3 + $0x98] sm:$0xff]   ;;  %v2329_v57 = vld [vmem:[%s3134_s3 + $0x60] sm:$0xff]   ;;  %v2333_v61 = vld [vmem:[%s3134_s3 + $0x68] sm:$0xff]  }
   0xf   :  { %286 = vmatprep.mubr.bf16.mxu0 %v2441_v3  ;;  %399 = vmatprep.mubr.bf16.mxu1 %v2441_v3  ;;  %v2331_v58 = vld [vmem:[%s3134_s3 + $0xe0] sm:$0xff]   ;;  %v2335_v62 = vld [vmem:[%s3134_s3 + $0xe8] sm:$0xff]   ;;  %v2337_v1 = vld [vmem:[%s3134_s3 + $0x70] sm:$0xff]  }
  0x10   :  { %472 = vmatprep.subr.bf16.mxu0 %v1932_v29  ;;  %585 = vmatprep.subr.bf16.mxu1 %v1934_v31  ;;  %v2330_v59 = vld [vmem:[%s3134_s3 + $0x20] sm:$0xff]   ;;  %v2334_v63 = vld [vmem:[%s3134_s3 + $0x28] sm:$0xff]   ;;  %v2339_v2 = vld [vmem:[%s3134_s3 + $0xf0] sm:$0xff]  }
  0x11   :  { %v2332_v60 = vld [vmem:[%s3134_s3 + $0xa0] sm:$0xff]   ;;  %v2336_v0 = vld [vmem:[%s3134_s3 + $0xa8] sm:$0xff]   ;;  %v2338_v4 = vld [vmem:[%s3134_s3 + $0x30] sm:$0xff]  }
  0x12   :  { %473 = vmatpush1.bf16.msra.mxu0 %v1931_v32  ;;  %586 = vmatpush1.bf16.msra.mxu1 %v1933_v33  ;;  %v2340_v5 = vld [vmem:[%s3134_s3 + $0xb0] sm:$0xff]   ;;  %v2341_v6 = vld [vmem:[%s3134_s3 + $0x78] sm:$0xff]   ;;  %v2345_v10 = vld [vmem:[%s3134_s3 + $0x140] sm:$0xff]  }
  0x13   :  { %2048 = vmatprep.subr.bf16.mxu0 %v2313_v34  ;;  %2112 = vmatprep.subr.bf16.mxu1 %v2315_v36  ;;  %v2343_v7 = vld [vmem:[%s3134_s3 + $0xf8] sm:$0xff]   ;;  %v2347_v11 = vld [vmem:[%s3134_s3 + $0x1c0] sm:$0xff]  }
  0x14   :  { %v2342_v8 = vld [vmem:[%s3134_s3 + $0x38] sm:$0xff]   ;;  %v2766_v17 = vld [vmem:[%s3135_s2] sm:$0xff] }
  0x15   :  { %1936 = vmatmul.mubr.msk.bf16.gmra.mrb[4].mxu0 %vm219_vm0, %v2539_v35  ;;  %1944 = vmatmul.mubr.msk.bf16.gmra.mrb[4].mxu1 %vm219_vm0, %v2539_v35  ;;  %v2344_v9 = vld [vmem:[%s3134_s3 + $0xb8] sm:$0xff]   ;;  %v2770_v18 = vrot.slane %v2766_v17, %v69_v14  ;;  %v2773_v19 = vrot.slane %v2766_v17, %v61_v15  ;;  %v2776_v20 = vrot.slane %v2766_v17, %v73_v16 }
  0x16   :  { %296 = vmatprep.mubr.bf16.mxu0 %v2441_v3  ;;  %409 = vmatprep.mubr.bf16.mxu1 %v2441_v3 }
  0x1d   :  { %1937 = vmatmul.mubr.msk.bf16.gmra.mrb[8].mxu0 %vm219_vm0, %v2553_v37  ;;  %1945 = vmatmul.mubr.msk.bf16.gmra.mrb[8].mxu1 %vm219_vm0, %v2553_v37 }
  0x1e   :  { %306 = vmatprep.mubr.bf16.mxu0 %v2441_v3  ;;  %419 = vmatprep.mubr.bf16.mxu1 %v2441_v3 }
  0x25   :  { %1938 = vmatmul.mubr.msk.bf16.gmra.mrb[12].mxu0 %vm219_vm0, %v2564_v38  ;;  %1946 = vmatmul.mubr.msk.bf16.gmra.mrb[12].mxu1 %vm219_vm0, %v2564_v38 }
  0x26   :  { %316 = vmatprep.mubr.bf16.mxu0 %v2441_v3  ;;  %429 = vmatprep.mubr.bf16.mxu1 %v2441_v3 }
  0x2d   :  { %1939 = vmatmul.mubr.msk.bf16.gmra.mrb[16].mxu0 %vm219_vm0, %v2575_v39  ;;  %1947 = vmatmul.mubr.msk.bf16.gmra.mrb[16].mxu1 %vm219_vm0, %v2575_v39 }
  0x2e   :  { %326 = vmatprep.mubr.bf16.mxu0 %v2441_v3  ;;  %439 = vmatprep.mubr.bf16.mxu1 %v2441_v3 }
  0x35   :  { %1940 = vmatmul.mubr.msk.bf16.gmra.mrb[20].mxu0 %vm219_vm0, %v2586_v40  ;;  %1948 = vmatmul.mubr.msk.bf16.gmra.mrb[20].mxu1 %vm219_vm0, %v2586_v40 }
  0x36   :  { %336 = vmatprep.mubr.bf16.mxu0 %v2441_v3  ;;  %449 = vmatprep.mubr.bf16.mxu1 %v2441_v3 }
  0x3d   :  { %1941 = vmatmul.mubr.msk.bf16.gmra.mrb[24].mxu0 %vm219_vm0, %v2597_v41  ;;  %1949 = vmatmul.mubr.msk.bf16.gmra.mrb[24].mxu1 %vm219_vm0, %v2597_v41 }
  0x3e   :  { %346 = vmatprep.mubr.bf16.mxu0 %v2441_v3  ;;  %459 = vmatprep.mubr.bf16.mxu1 %v2441_v3 }
  0x45   :  { %1942 = vmatmul.mubr.msk.bf16.gmra.mrb[28].mxu0 %vm219_vm0, %v2608_v42  ;;  %1950 = vmatmul.mubr.msk.bf16.gmra.mrb[28].mxu1 %vm219_vm0, %v2608_v42 }
  0x46   :  { %502 = vmatprep.mubr.bf16.mxu0 %v2441_v3  ;;  %615 = vmatprep.mubr.bf16.mxu1 %v2441_v3 }
  0x4d   :  { %1951 = vmatmul.mubr.msk.bf16.vlgmr.msra.gmra.mrb[32].mxu0 %vm219_vm0, %v2513_v23  ;;  %1959 = vmatmul.mubr.msk.bf16.vlgmr.msra.gmra.mrb[32].mxu1 %vm219_vm0, %v2513_v23 }
  0x4e   :  { %512 = vmatprep.mubr.bf16.mxu0 %v2441_v3  ;;  %625 = vmatprep.mubr.bf16.mxu1 %v2441_v3 }
  0x4f   :  { %2049 = vmatpush3.bf16.msra.mxu0 %v2314_v43  ;;  %2113 = vmatpush3.bf16.msra.mxu1 %v2316_v44  ;;  %v2348_v43 = vld [vmem:[%s3134_s3 + $0x180] sm:$0xff]   ;;  %v2349_v44 = vld [vmem:[%s3134_s3 + $0x148] sm:$0xff]  }
  0x50   :  { %2050 = vmatprep.subr.bf16.mxu0 %v2317_v45  ;;  %2114 = vmatprep.subr.bf16.mxu1 %v2319_v46  ;;  %v2351_v46 = vld [vmem:[%s3134_s3 + $0x1c8] sm:$0xff]  }
  0x53   :  { %2051 = vmatpush3.bf16.msra.mxu0 %v2318_v47  ;;  %2115 = vmatpush3.bf16.msra.mxu1 %v2320_v48 }
  0x54   :  { %2052 = vmatprep.subr.bf16.mxu0 %v2321_v49  ;;  %2116 = vmatprep.subr.bf16.mxu1 %v2323_v50 }
  0x55   :  { %1952 = vmatmul.mubr.msk.bf16.gmra.mrb[36].mxu0 %vm219_vm0, %v2539_v35  ;;  %1960 = vmatmul.mubr.msk.bf16.gmra.mrb[36].mxu1 %vm219_vm0, %v2539_v35 }
  0x56   :  { %522 = vmatprep.mubr.bf16.mxu0 %v2441_v3  ;;  %635 = vmatprep.mubr.bf16.mxu1 %v2441_v3 }
  0x57   :  { %2053 = vmatpush3.bf16.msra.mxu0 %v2322_v51  ;;  %2117 = vmatpush3.bf16.msra.mxu1 %v2324_v52  ;;  %v2350_v52 = vld [vmem:[%s3134_s3 + $0x108] sm:$0xff]  }
  0x58   :  { %2054 = vmatprep.subr.bf16.mxu0 %v2325_v53  ;;  %2118 = vmatprep.subr.bf16.mxu1 %v2327_v54 }
  0x5b   :  { %2055 = vmatpush3.bf16.msra.mxu0 %v2326_v55  ;;  %2119 = vmatpush3.bf16.msra.mxu1 %v2328_v56 }
  0x5c   :  { %2056 = vmatprep.subr.bf16.mxu0 %v2329_v57  ;;  %2120 = vmatprep.subr.bf16.mxu1 %v2331_v58  ;;  %v2352_v58 = vld [vmem:[%s3134_s3 + $0x188] sm:$0xff]  }
  0x5d   :  { %1953 = vmatmul.mubr.msk.bf16.gmra.mrb[40].mxu0 %vm219_vm0, %v2553_v37  ;;  %1961 = vmatmul.mubr.msk.bf16.gmra.mrb[40].mxu1 %vm219_vm0, %v2553_v37 }
  0x5e   :  { %532 = vmatprep.mubr.bf16.mxu0 %v2441_v3  ;;  %645 = vmatprep.mubr.bf16.mxu1 %v2441_v3 }
  0x5f   :  { %2057 = vmatpush3.bf16.msra.mxu0 %v2330_v59  ;;  %2121 = vmatpush3.bf16.msra.mxu1 %v2332_v60  ;;  %v2353_v59 = vld [vmem:[%s3134_s3 + $0x150] sm:$0xff]  }
  0x60   :  { %2058 = vmatprep.subr.bf16.mxu0 %v2333_v61  ;;  %2122 = vmatprep.subr.bf16.mxu1 %v2335_v62 }
  0x63   :  { %2059 = vmatpush3.bf16.msra.mxu0 %v2334_v63  ;;  %2123 = vmatpush3.bf16.msra.mxu1 %v2336_v0  ;;  %v2355_v0 = vld [vmem:[%s3134_s3 + $0x1d0] sm:$0xff]  }
  0x64   :  { %2060 = vmatprep.subr.bf16.mxu0 %v2337_v1  ;;  %2124 = vmatprep.subr.bf16.mxu1 %v2339_v2 }
  0x65   :  { %1954 = vmatmul.mubr.msk.bf16.gmra.mrb[44].mxu0 %vm219_vm0, %v2564_v38  ;;  %1962 = vmatmul.mubr.msk.bf16.gmra.mrb[44].mxu1 %vm219_vm0, %v2564_v38 }
  0x66   :  { %542 = vmatprep.mubr.bf16.mxu0 %v2441_v3  ;;  %655 = vmatprep.mubr.bf16.mxu1 %v2441_v3 }
  0x67   :  { %2061 = vmatpush3.bf16.msra.mxu0 %v2338_v4  ;;  %2125 = vmatpush3.bf16.msra.mxu1 %v2340_v5 }
  0x68   :  { %2062 = vmatprep.subr.bf16.mxu0 %v2341_v6  ;;  %2126 = vmatprep.subr.bf16.mxu1 %v2343_v7  ;;  %v2354_v6 = vld [vmem:[%s3134_s3 + $0x110] sm:$0xff]  }
  0x6b   :  { %2063 = vmatpush3.bf16.msra.mxu0 %v2342_v8  ;;  %2127 = vmatpush3.bf16.msra.mxu1 %v2344_v9  ;;  %v2356_v8 = vld [vmem:[%s3134_s3 + $0x190] sm:$0xff]   ;;  %v2357_v9 = vld [vmem:[%s3134_s3 + $0x158] sm:$0xff]  }
  0x6c   :  { %2176 = vmatprep.subr.bf16.mxu0 %v2345_v10  ;;  %2240 = vmatprep.subr.bf16.mxu1 %v2347_v11  ;;  %v2359_v11 = vld [vmem:[%s3134_s3 + $0x1d8] sm:$0xff]  }
  0x6d   :  { %1955 = vmatmul.mubr.msk.bf16.gmra.mrb[48].mxu0 %vm219_vm0, %v2575_v39  ;;  %1963 = vmatmul.mubr.msk.bf16.gmra.mrb[48].mxu1 %vm219_vm0, %v2575_v39 }
  0x6e   :  { %552 = vmatprep.mubr.bf16.mxu0 %v2441_v3  ;;  %665 = vmatprep.mubr.bf16.mxu1 %v2441_v3 }
  0x75   :  { %1956 = vmatmul.mubr.msk.bf16.gmra.mrb[52].mxu0 %vm219_vm0, %v2586_v40  ;;  %1964 = vmatmul.mubr.msk.bf16.gmra.mrb[52].mxu1 %vm219_vm0, %v2586_v40 }
  0x76   :  { %562 = vmatprep.mubr.bf16.mxu0 %v2441_v3  ;;  %675 = vmatprep.mubr.bf16.mxu1 %v2441_v3 }
  0x7d   :  { %1957 = vmatmul.mubr.msk.bf16.gmra.mrb[56].mxu0 %vm219_vm0, %v2597_v41  ;;  %1965 = vmatmul.mubr.msk.bf16.gmra.mrb[56].mxu1 %vm219_vm0, %v2597_v41  ;;  %v2346_v41 = vld [vmem:[%s3134_s3 + $0x100] sm:$0xff]  }
  0x7e   :  { %572 = vmatprep.mubr.bf16.mxu0 %v2441_v3  ;;  %685 = vmatprep.mubr.bf16.mxu1 %v2441_v3  ;;  %v65_v3 = vsub.s32 1, %v2758_v13 }
  0x80   :  { %v2779_v22 = vrot.slane %v2766_v17, %v65_v3 }
  0x85   :  { %1958 = vmatmul.mubr.msk.bf16.gmra.mrb[60].mxu0 %vm219_vm0, %v2608_v42  ;;  %1966 = vmatmul.mubr.msk.bf16.gmra.mrb[60].mxu1 %vm219_vm0, %v2608_v42 }
  0xe0   :  { %v278_v21 = vpop.f32.mrb[0].mxu0  ;;  %v391_v23 = vpop.f32.mrb[0].mxu1 }
  0xe1   :  { %v280_v24 = vpop.f32.mrb[1].mxu0  ;;  %v392_v25 = vadd.f32 %v391_v23, %v2770_v18  ;;  %v393_v26 = vpop.f32.mrb[1].mxu1  ;;  %v279_v28 = vadd.f32 %v278_v21, %v2773_v19  ;;  %v2358_v21 = vld [vmem:[%s3134_s3 + $0x118] sm:$0xff]  }
  0xe2   :  { %v282_v27 = vpop.f32.mrb[2].mxu0  ;;  %v394_v29 = vadd.f32 %v393_v26, %v2776_v20  ;;  %v395_v31 = vpop.f32.mrb[2].mxu1  ;;  %v281_v33 = vadd.f32 %v280_v24, %v2779_v22 }
  0xe3   :  { %v283_v30 = vadd.f32 %v282_v27, %v2773_v19  ;;  %v284_v32 = vpop.f32.mrb[3].mxu0  ;;  %v396_v34 = vadd.f32 %v395_v31, %v2770_v18  ;;  %v397_v36 = vpop.f32.mrb[3].mxu1 }
  0xe4   :  { %v285_v35 = vadd.f32 %v284_v32, %v2779_v22  ;;  %v398_v38 = vadd.f32 %v397_v36, %v2776_v20 }
  0xe5   :  { %v696_v37 = vpack.c.bf16 %v283_v30, %v279_v28  ;;  %v698_v39 = vpack.c.bf16 %v396_v34, %v392_v25  ;;  %v2360_v28 = vld [vmem:[%s3134_s3 + $0x198] sm:$0xff]   ;;  %v2363_v34 = vld [vmem:[%s3134_s3 + $0x1e0] sm:$0xff]  }
  0xe6   :  { %v697_v40 = vpack.c.bf16 %v285_v35, %v281_v33  ;;  %v699_v42 = vpack.c.bf16 %v398_v38, %v394_v29  ;;  %v2361_v29 = vld [vmem:[%s3134_s3 + $0x160] sm:$0xff]  }
  0xe8   :  { %v288_v45 = vpop.f32.mrb[4].mxu0  ;;  %1439 = vmatprep.mubr.bf16.mxu0 %v697_v40  ;;  %v401_v47 = vpop.f32.mrb[4].mxu1  ;;  %1536 = vmatprep.mubr.bf16.mxu1 %v699_v42  ;;  %v2365_v42 = vld [vmem:[%s3134_s3 + $0x168] sm:$0xff]  }
  0xe9   :  { %v290_v48 = vpop.f32.mrb[5].mxu0  ;;  %1440 = vmatmul.mubr.bf16.vlgmr.msra.gmra.mrb[64].mxu0 %v696_v37  ;;  %v402_v49 = vadd.f32 %v401_v47, %v2770_v18  ;;  %v403_v50 = vpop.f32.mrb[5].mxu1  ;;  %1537 = vmatmul.mubr.bf16.vlgmr.msra.gmra.mrb[64].mxu1 %v698_v39  ;;  %v289_v53 = vadd.f32 %v288_v45, %v2773_v19  ;;  %v2362_v39 = vld [vmem:[%s3134_s3 + $0x120] sm:$0xff]  }
  0xea   :  { %v292_v51 = vpop.f32.mrb[6].mxu0  ;;  %2177 = vmatpush3.bf16.msra.mxu0 %v2346_v41  ;;  %v404_v54 = vadd.f32 %v403_v50, %v2776_v20  ;;  %v405_v56 = vpop.f32.mrb[6].mxu1  ;;  %2241 = vmatpush3.bf16.msra.mxu1 %v2348_v43  ;;  %v291_v60 = vadd.f32 %v290_v48, %v2779_v22  ;;  %v2364_v41 = vld [vmem:[%s3134_s3 + $0x1a0] sm:$0xff]   ;;  %v2366_v50 = vld [vmem:[%s3134_s3 + $0x128] sm:$0xff]  }
  0xeb   :  { %v293_v55 = vadd.f32 %v292_v51, %v2773_v19  ;;  %v294_v57 = vpop.f32.mrb[7].mxu0  ;;  %2178 = vmatprep.subr.bf16.mxu0 %v2349_v44  ;;  %v406_v61 = vadd.f32 %v405_v56, %v2770_v18  ;;  %v407_v63 = vpop.f32.mrb[7].mxu1  ;;  %2242 = vmatprep.subr.bf16.mxu1 %v2351_v46  ;;  %v2367_v44 = vld [vmem:[%s3134_s3 + $0x1e8] sm:$0xff]  }
  0xec   :  { %v295_v62 = vadd.f32 %v294_v57, %v2779_v22  ;;  %v408_v2 = vadd.f32 %v407_v63, %v2776_v20  ;;  %v2368_v56 = vld [vmem:[%s3134_s3 + $0x1a8] sm:$0xff]   ;;  %v2369_v57 = vld [vmem:[%s3134_s3 + $0x170] sm:$0xff]  }
  0xed   :  { %v704_v1 = vpack.c.bf16 %v293_v55, %v289_v53  ;;  %v706_v4 = vpack.c.bf16 %v406_v61, %v402_v49 }
  0xee   :  { %v705_v5 = vpack.c.bf16 %v295_v62, %v291_v60  ;;  %2179 = vmatpush3.bf16.msra.mxu0 %v2350_v52  ;;  %v707_v7 = vpack.c.bf16 %v408_v2, %v404_v54  ;;  %2243 = vmatpush3.bf16.msra.mxu1 %v2352_v58  ;;  %v2371_v62 = vld [vmem:[%s3134_s3 + $0x1f0] sm:$0xff]  }
  0xef   :  { %2180 = vmatprep.subr.bf16.mxu0 %v2353_v59  ;;  %2244 = vmatprep.subr.bf16.mxu1 %v2355_v0 }
  0xf0   :  { %v298_v10 = vpop.f32.mrb[8].mxu0  ;;  %1447 = vmatprep.mubr.bf16.mxu0 %v705_v5  ;;  %v411_v12 = vpop.f32.mrb[8].mxu1  ;;  %1544 = vmatprep.mubr.bf16.mxu1 %v707_v7  ;;  %v2373_v7 = vld [vmem:[%s3134_s3 + $0x178] sm:$0xff]  }
  0xf1   :  { %v300_v14 = vpop.f32.mrb[9].mxu0  ;;  %1448 = vmatmul.mubr.bf16.gmra.mrb[68].mxu0 %v704_v1  ;;  %v412_v15 = vadd.f32 %v411_v12, %v2770_v18  ;;  %v413_v16 = vpop.f32.mrb[9].mxu1  ;;  %1545 = vmatmul.mubr.bf16.gmra.mrb[68].mxu1 %v706_v4  ;;  %v299_v23 = vadd.f32 %v298_v10, %v2773_v19  ;;  %v2370_v4 = vld [vmem:[%s3134_s3 + $0x130] sm:$0xff]  }
  0xf2   :  { %v302_v3 = vpop.f32.mrb[10].mxu0  ;;  %2181 = vmatpush3.bf16.msra.mxu0 %v2354_v6  ;;  %v414_v24 = vadd.f32 %v413_v16, %v2776_v20  ;;  %v415_v26 = vpop.f32.mrb[10].mxu1  ;;  %2245 = vmatpush3.bf16.msra.mxu1 %v2356_v8  ;;  %v301_v30 = vadd.f32 %v300_v14, %v2779_v22  ;;  %v2372_v6 = vld [vmem:[%s3134_s3 + $0x1b0] sm:$0xff]   ;;  %v2374_v16 = vld [vmem:[%s3134_s3 + $0x138] sm:$0xff]  }
  0xf3   :  { %v303_v25 = vadd.f32 %v302_v3, %v2773_v19  ;;  %v304_v27 = vpop.f32.mrb[11].mxu0  ;;  %2182 = vmatprep.subr.bf16.mxu0 %v2357_v9  ;;  %v416_v31 = vadd.f32 %v415_v26, %v2770_v18  ;;  %v417_v33 = vpop.f32.mrb[11].mxu1  ;;  %2246 = vmatprep.subr.bf16.mxu1 %v2359_v11  ;;  %v2375_v9 = vld [vmem:[%s3134_s3 + $0x1f8] sm:$0xff]  }
  0xf4   :  { %v305_v32 = vadd.f32 %v304_v27, %v2779_v22  ;;  %v418_v36 = vadd.f32 %v417_v33, %v2776_v20  ;;  %v2376_v26 = vld [vmem:[%s3134_s3 + $0x1b8] sm:$0xff]  }
  0xf5   :  { %v712_v35 = vpack.c.bf16 %v303_v25, %v299_v23  ;;  %v714_v37 = vpack.c.bf16 %v416_v31, %v412_v15 }
  0xf6   :  { %v713_v38 = vpack.c.bf16 %v305_v32, %v301_v30  ;;  %2183 = vmatpush3.bf16.msra.mxu0 %v2358_v21  ;;  %v715_v40 = vpack.c.bf16 %v418_v36, %v414_v24  ;;  %2247 = vmatpush3.bf16.msra.mxu1 %v2360_v28 }
  0xf7   :  { %2184 = vmatprep.subr.bf16.mxu0 %v2361_v29  ;;  %2248 = vmatprep.subr.bf16.mxu1 %v2363_v34 }
  0xf8   :  { %v308_v43 = vpop.f32.mrb[12].mxu0  ;;  %1455 = vmatprep.mubr.bf16.mxu0 %v713_v38  ;;  %v421_v45 = vpop.f32.mrb[12].mxu1  ;;  %1552 = vmatprep.mubr.bf16.mxu1 %v715_v40 }
  0xf9   :  { %v310_v46 = vpop.f32.mrb[13].mxu0  ;;  %1456 = vmatmul.mubr.bf16.gmra.mrb[72].mxu0 %v712_v35  ;;  %v422_v47 = vadd.f32 %v421_v45, %v2770_v18  ;;  %v423_v48 = vpop.f32.mrb[13].mxu1  ;;  %1553 = vmatmul.mubr.bf16.gmra.mrb[72].mxu1 %v714_v37  ;;  %v309_v51 = vadd.f32 %v308_v43, %v2773_v19 }
  0xfa   :  { %v312_v49 = vpop.f32.mrb[14].mxu0  ;;  %2185 = vmatpush3.bf16.msra.mxu0 %v2362_v39  ;;  %v424_v52 = vadd.f32 %v423_v48, %v2776_v20  ;;  %v425_v54 = vpop.f32.mrb[14].mxu1  ;;  %2249 = vmatpush3.bf16.msra.mxu1 %v2364_v41  ;;  %v311_v58 = vadd.f32 %v310_v46, %v2779_v22 }
  0xfb   :  { %v313_v53 = vadd.f32 %v312_v49, %v2773_v19  ;;  %v314_v55 = vpop.f32.mrb[15].mxu0  ;;  %2186 = vmatprep.subr.bf16.mxu0 %v2365_v42  ;;  %v426_v59 = vadd.f32 %v425_v54, %v2770_v18  ;;  %v427_v61 = vpop.f32.mrb[15].mxu1  ;;  %2250 = vmatprep.subr.bf16.mxu1 %v2367_v44 }
  0xfc   :  { %v315_v60 = vadd.f32 %v314_v55, %v2779_v22  ;;  %v428_v0 = vadd.f32 %v427_v61, %v2776_v20 }
  0xfd   :  { %v720_v63 = vpack.c.bf16 %v313_v53, %v309_v51  ;;  %v722_v1 = vpack.c.bf16 %v426_v59, %v422_v47 }
  0xfe   :  { %v721_v2 = vpack.c.bf16 %v315_v60, %v311_v58  ;;  %2187 = vmatpush3.bf16.msra.mxu0 %v2366_v50  ;;  %v723_v5 = vpack.c.bf16 %v428_v0, %v424_v52  ;;  %2251 = vmatpush3.bf16.msra.mxu1 %v2368_v56 }
  0xff   :  { %2188 = vmatprep.subr.bf16.mxu0 %v2369_v57  ;;  %2252 = vmatprep.subr.bf16.mxu1 %v2371_v62 }
 0x100   :  { %v318_v8 = vpop.f32.mrb[16].mxu0  ;;  %1463 = vmatprep.mubr.bf16.mxu0 %v721_v2  ;;  %v431_v10 = vpop.f32.mrb[16].mxu1  ;;  %1560 = vmatprep.mubr.bf16.mxu1 %v723_v5 }
 0x101   :  { %v320_v11 = vpop.f32.mrb[17].mxu0  ;;  %1464 = vmatmul.mubr.bf16.gmra.mrb[76].mxu0 %v720_v63  ;;  %v432_v12 = vadd.f32 %v431_v10, %v2770_v18  ;;  %v433_v14 = vpop.f32.mrb[17].mxu1  ;;  %1561 = vmatmul.mubr.bf16.gmra.mrb[76].mxu1 %v722_v1  ;;  %v319_v3 = vadd.f32 %v318_v8, %v2773_v19 }
 0x102   :  { %v322_v15 = vpop.f32.mrb[18].mxu0  ;;  %2189 = vmatpush3.bf16.msra.mxu0 %v2370_v4  ;;  %v434_v21 = vadd.f32 %v433_v14, %v2776_v20  ;;  %v435_v24 = vpop.f32.mrb[18].mxu1  ;;  %2253 = vmatpush3.bf16.msra.mxu1 %v2372_v6  ;;  %v321_v27 = vadd.f32 %v320_v11, %v2779_v22 }
 0x103   :  { %v323_v23 = vadd.f32 %v322_v15, %v2773_v19  ;;  %v324_v25 = vpop.f32.mrb[19].mxu0  ;;  %2190 = vmatprep.subr.bf16.mxu0 %v2373_v7  ;;  %v436_v28 = vadd.f32 %v435_v24, %v2770_v18  ;;  %v437_v30 = vpop.f32.mrb[19].mxu1  ;;  %2254 = vmatprep.subr.bf16.mxu1 %v2375_v9  ;;  %v77_v24 = vsub.s32 4, %v2758_v13 }
 0x104   :  { %v325_v29 = vadd.f32 %v324_v25, %v2779_v22  ;;  %v438_v32 = vadd.f32 %v437_v30, %v2776_v20  ;;  %v85_v25 = vsub.s32 6, %v2758_v13 }
 0x105   :  { %v728_v31 = vpack.c.bf16 %v323_v23, %v319_v3  ;;  %v730_v33 = vpack.c.bf16 %v436_v28, %v432_v12 }
 0x106   :  { %v729_v34 = vpack.c.bf16 %v325_v29, %v321_v27  ;;  %2191 = vmatpush3.bf16.msra.mxu0 %v2374_v16  ;;  %v731_v35 = vpack.c.bf16 %v438_v32, %v434_v21  ;;  %2255 = vmatpush3.bf16.msra.mxu1 %v2376_v26 }
 0x108   :  { %v328_v36 = vpop.f32.mrb[20].mxu0  ;;  %1471 = vmatprep.mubr.bf16.mxu0 %v729_v34  ;;  %v441_v37 = vpop.f32.mrb[20].mxu1  ;;  %1568 = vmatprep.mubr.bf16.mxu1 %v731_v35 }
 0x109   :  { %v330_v38 = vpop.f32.mrb[21].mxu0  ;;  %1472 = vmatmul.mubr.bf16.gmra.mrb[80].mxu0 %v728_v31  ;;  %v442_v39 = vadd.f32 %v441_v37, %v2770_v18  ;;  %v443_v40 = vpop.f32.mrb[21].mxu1  ;;  %1569 = vmatmul.mubr.bf16.gmra.mrb[80].mxu1 %v730_v33  ;;  %v329_v42 = vadd.f32 %v328_v36, %v2773_v19  ;;  %v89_v31 = vsub.s32 7, %v2758_v13  ;;  %v81_v36 = vsub.s32 5, %v2758_v13 }
 0x10a   :  { %v332_v41 = vpop.f32.mrb[22].mxu0  ;;  %v444_v43 = vadd.f32 %v443_v40, %v2776_v20  ;;  %v445_v45 = vpop.f32.mrb[22].mxu1  ;;  %v331_v47 = vadd.f32 %v330_v38, %v2779_v22 }
 0x10b   :  { %v333_v44 = vadd.f32 %v332_v41, %v2773_v19  ;;  %v334_v46 = vpop.f32.mrb[23].mxu0  ;;  %v446_v48 = vadd.f32 %v445_v45, %v2770_v18  ;;  %v447_v50 = vpop.f32.mrb[23].mxu1 }
 0x10c   :  { %v335_v49 = vadd.f32 %v334_v46, %v2779_v22  ;;  %v448_v52 = vadd.f32 %v447_v50, %v2776_v20 }
 0x10d   :  { %v736_v51 = vpack.c.bf16 %v333_v44, %v329_v42  ;;  %v738_v53 = vpack.c.bf16 %v446_v48, %v442_v39  ;;  %v2943_v42 = vrot.slane %v2766_v17, %v77_v24 }
 0x10e   :  { %v737_v54 = vpack.c.bf16 %v335_v49, %v331_v47  ;;  %v739_v55 = vpack.c.bf16 %v448_v52, %v444_v43  ;;  %v2946_v43 = vrot.slane %v2766_v17, %v89_v31 }
 0x110   :  { %v338_v56 = vpop.f32.mrb[24].mxu0  ;;  %1479 = vmatprep.mubr.bf16.mxu0 %v737_v54  ;;  %v451_v57 = vpop.f32.mrb[24].mxu1  ;;  %1576 = vmatprep.mubr.bf16.mxu1 %v739_v55 }
 0x111   :  { %v340_v58 = vpop.f32.mrb[25].mxu0  ;;  %1480 = vmatmul.mubr.bf16.gmra.mrb[84].mxu0 %v736_v51  ;;  %v452_v59 = vadd.f32 %v451_v57, %v2770_v18  ;;  %v453_v60 = vpop.f32.mrb[25].mxu1  ;;  %1577 = vmatmul.mubr.bf16.gmra.mrb[84].mxu1 %v738_v53  ;;  %v339_v62 = vadd.f32 %v338_v56, %v2773_v19 }
 0x112   :  { %v342_v61 = vpop.f32.mrb[26].mxu0  ;;  %v454_v63 = vadd.f32 %v453_v60, %v2776_v20  ;;  %v455_v1 = vpop.f32.mrb[26].mxu1  ;;  %v341_v4 = vadd.f32 %v340_v58, %v2779_v22 }
 0x113   :  { %v343_v0 = vadd.f32 %v342_v61, %v2773_v19  ;;  %v344_v2 = vpop.f32.mrb[27].mxu0  ;;  %v456_v5 = vadd.f32 %v455_v1, %v2770_v18  ;;  %v457_v7 = vpop.f32.mrb[27].mxu1 }
 0x114   :  { %v345_v6 = vadd.f32 %v344_v2, %v2779_v22  ;;  %v458_v9 = vadd.f32 %v457_v7, %v2776_v20 }
 0x115   :  { %v744_v8 = vpack.c.bf16 %v343_v0, %v339_v62  ;;  %v746_v10 = vpack.c.bf16 %v456_v5, %v452_v59 }
 0x116   :  { %v745_v11 = vpack.c.bf16 %v345_v6, %v341_v4  ;;  %v747_v12 = vpack.c.bf16 %v458_v9, %v454_v63 }
 0x118   :  { %v348_v14 = vpop.f32.mrb[28].mxu0  ;;  %1487 = vmatprep.mubr.bf16.mxu0 %v745_v11  ;;  %v461_v15 = vpop.f32.mrb[28].mxu1  ;;  %1584 = vmatprep.mubr.bf16.mxu1 %v747_v12 }
 0x119   :  { %v350_v16 = vpop.f32.mrb[29].mxu0  ;;  %1488 = vmatmul.mubr.bf16.gmra.mrb[88].mxu0 %v744_v8  ;;  %v462_v3 = vadd.f32 %v461_v15, %v2770_v18  ;;  %v463_v21 = vpop.f32.mrb[29].mxu1  ;;  %1585 = vmatmul.mubr.bf16.gmra.mrb[88].mxu1 %v746_v10  ;;  %v349_v26 = vadd.f32 %v348_v14, %v2773_v19 }
 0x11a   :  { %v352_v23 = vpop.f32.mrb[30].mxu0  ;;  %v464_v27 = vadd.f32 %v463_v21, %v2776_v20  ;;  %v465_v29 = vpop.f32.mrb[30].mxu1  ;;  %v351_v32 = vadd.f32 %v350_v16, %v2779_v22 }
 0x11b   :  { %v353_v28 = vadd.f32 %v352_v23, %v2773_v19  ;;  %v354_v30 = vpop.f32.mrb[31].mxu0  ;;  %v466_v33 = vadd.f32 %v465_v29, %v2770_v18  ;;  %v467_v35 = vpop.f32.mrb[31].mxu1  ;;  %v2940_v19 = vrot.slane %v2766_v17, %v85_v25 }
 0x11c   :  { %v355_v34 = vadd.f32 %v354_v30, %v2779_v22  ;;  %v468_v38 = vadd.f32 %v467_v35, %v2776_v20  ;;  %v2949_v22 = vrot.slane %v2766_v17, %v81_v36 }
 0x11d   :  { %v752_v37 = vpack.c.bf16 %v353_v28, %v349_v26  ;;  %v754_v39 = vpack.c.bf16 %v466_v33, %v462_v3 }
 0x11e   :  { %v753_v40 = vpack.c.bf16 %v355_v34, %v351_v32  ;;  %v755_v41 = vpack.c.bf16 %v468_v38, %v464_v27 }
 0x120   :  { %v504_v18 = vpop.f32.mrb[32].mxu0  ;;  %1495 = vmatprep.mubr.bf16.mxu0 %v753_v40  ;;  %v617_v13 = vpop.f32.mrb[32].mxu1  ;;  %1592 = vmatprep.mubr.bf16.mxu1 %v755_v41 }
 0x121   :  { %v506_v20 = vpop.f32.mrb[33].mxu0  ;;  %1496 = vmatmul.mubr.bf16.gmra.mrb[92].mxu0 %v752_v37  ;;  %v618_v44 = vadd.f32 %v617_v13, %v2940_v19  ;;  %v619_v45 = vpop.f32.mrb[33].mxu1  ;;  %1593 = vmatmul.mubr.bf16.gmra.mrb[92].mxu1 %v754_v39  ;;  %v505_v47 = vadd.f32 %v504_v18, %v2943_v42 }
 0x122   :  { %v508_v46 = vpop.f32.mrb[34].mxu0  ;;  %v620_v48 = vadd.f32 %v619_v45, %v2946_v43  ;;  %v621_v50 = vpop.f32.mrb[34].mxu1  ;;  %v507_v17 = vadd.f32 %v506_v20, %v2949_v22 }
 0x123   :  { %v509_v49 = vadd.f32 %v508_v46, %v2943_v42  ;;  %v510_v51 = vpop.f32.mrb[35].mxu0  ;;  %v622_v52 = vadd.f32 %v621_v50, %v2940_v19  ;;  %v623_v54 = vpop.f32.mrb[35].mxu1 }
 0x124   :  { %v511_v53 = vadd.f32 %v510_v51, %v2949_v22  ;;  %v624_v56 = vadd.f32 %v623_v54, %v2946_v43 }
 0x125   :  { %v700_v55 = vpack.c.bf16 %v509_v49, %v505_v47  ;;  %v702_v57 = vpack.c.bf16 %v622_v52, %v618_v44 }
 0x126   :  { %v701_v58 = vpack.c.bf16 %v511_v53, %v507_v17  ;;  %v703_v59 = vpack.c.bf16 %v624_v56, %v620_v48 }
 0x128   :  { %v514_v60 = vpop.f32.mrb[36].mxu0  ;;  %1633 = vmatprep.mubr.bf16.mxu0 %v701_v58  ;;  %v627_v61 = vpop.f32.mrb[36].mxu1  ;;  %1730 = vmatprep.mubr.bf16.mxu1 %v703_v59 }
 0x129   :  { %v516_v62 = vpop.f32.mrb[37].mxu0  ;;  %1634 = vmatmul.mubr.bf16.vlgmr.msra.gmra.mrb[96].mxu0 %v700_v55  ;;  %v628_v63 = vadd.f32 %v627_v61, %v2940_v19  ;;  %v629_v0 = vpop.f32.mrb[37].mxu1  ;;  %1731 = vmatmul.mubr.bf16.vlgmr.msra.gmra.mrb[96].mxu1 %v702_v57  ;;  %v515_v2 = vadd.f32 %v514_v60, %v2943_v42 }
 0x12a   :  { %v518_v1 = vpop.f32.mrb[38].mxu0  ;;  %v630_v4 = vadd.f32 %v629_v0, %v2946_v43  ;;  %v631_v6 = vpop.f32.mrb[38].mxu1  ;;  %v517_v8 = vadd.f32 %v516_v62, %v2949_v22 }
 0x12b   :  { %v519_v5 = vadd.f32 %v518_v1, %v2943_v42  ;;  %v520_v7 = vpop.f32.mrb[39].mxu0  ;;  %v632_v9 = vadd.f32 %v631_v6, %v2940_v19  ;;  %v633_v11 = vpop.f32.mrb[39].mxu1 }
 0x12c   :  { %v521_v10 = vadd.f32 %v520_v7, %v2949_v22  ;;  %v634_v14 = vadd.f32 %v633_v11, %v2946_v43 }
 0x12d   :  { %v708_v12 = vpack.c.bf16 %v519_v5, %v515_v2  ;;  %v710_v15 = vpack.c.bf16 %v632_v9, %v628_v63 }
 0x12e   :  { %v709_v16 = vpack.c.bf16 %v521_v10, %v517_v8  ;;  %v711_v3 = vpack.c.bf16 %v634_v14, %v630_v4 }
 0x130   :  { %v524_v21 = vpop.f32.mrb[40].mxu0  ;;  %1641 = vmatprep.mubr.bf16.mxu0 %v709_v16  ;;  %v637_v23 = vpop.f32.mrb[40].mxu1  ;;  %1738 = vmatprep.mubr.bf16.mxu1 %v711_v3 }
 0x131   :  { %v526_v24 = vpop.f32.mrb[41].mxu0  ;;  %1642 = vmatmul.mubr.bf16.gmra.mrb[100].mxu0 %v708_v12  ;;  %v638_v25 = vadd.f32 %v637_v23, %v2940_v19  ;;  %v639_v26 = vpop.f32.mrb[41].mxu1  ;;  %1739 = vmatmul.mubr.bf16.gmra.mrb[100].mxu1 %v710_v15  ;;  %v525_v28 = vadd.f32 %v524_v21, %v2943_v42 }
 0x132   :  { %v528_v27 = vpop.f32.mrb[42].mxu0  ;;  %v640_v29 = vadd.f32 %v639_v26, %v2946_v43  ;;  %v641_v31 = vpop.f32.mrb[42].mxu1  ;;  %v527_v33 = vadd.f32 %v526_v24, %v2949_v22 }
 0x133   :  { %v529_v30 = vadd.f32 %v528_v27, %v2943_v42  ;;  %v530_v32 = vpop.f32.mrb[43].mxu0  ;;  %v642_v34 = vadd.f32 %v641_v31, %v2940_v19  ;;  %v643_v36 = vpop.f32.mrb[43].mxu1 }
 0x134   :  { %v531_v35 = vadd.f32 %v530_v32, %v2949_v22  ;;  %v644_v38 = vadd.f32 %v643_v36, %v2946_v43 }
 0x135   :  { %v716_v37 = vpack.c.bf16 %v529_v30, %v525_v28  ;;  %v718_v39 = vpack.c.bf16 %v642_v34, %v638_v25 }
 0x136   :  { %v717_v40 = vpack.c.bf16 %v531_v35, %v527_v33  ;;  %v719_v41 = vpack.c.bf16 %v644_v38, %v640_v29 }
 0x138   :  { %v534_v18 = vpop.f32.mrb[44].mxu0  ;;  %1649 = vmatprep.mubr.bf16.mxu0 %v717_v40  ;;  %v647_v13 = vpop.f32.mrb[44].mxu1  ;;  %1746 = vmatprep.mubr.bf16.mxu1 %v719_v41 }
 0x139   :  { %v536_v20 = vpop.f32.mrb[45].mxu0  ;;  %1650 = vmatmul.mubr.bf16.gmra.mrb[104].mxu0 %v716_v37  ;;  %v648_v44 = vadd.f32 %v647_v13, %v2940_v19  ;;  %v649_v45 = vpop.f32.mrb[45].mxu1  ;;  %1747 = vmatmul.mubr.bf16.gmra.mrb[104].mxu1 %v718_v39  ;;  %v535_v47 = vadd.f32 %v534_v18, %v2943_v42 }
 0x13a   :  { %v538_v46 = vpop.f32.mrb[46].mxu0  ;;  %v650_v48 = vadd.f32 %v649_v45, %v2946_v43  ;;  %v651_v50 = vpop.f32.mrb[46].mxu1  ;;  %v537_v17 = vadd.f32 %v536_v20, %v2949_v22 }
 0x13b   :  { %v539_v49 = vadd.f32 %v538_v46, %v2943_v42  ;;  %v540_v51 = vpop.f32.mrb[47].mxu0  ;;  %v652_v52 = vadd.f32 %v651_v50, %v2940_v19  ;;  %v653_v54 = vpop.f32.mrb[47].mxu1 }
 0x13c   :  { %v541_v53 = vadd.f32 %v540_v51, %v2949_v22  ;;  %v654_v56 = vadd.f32 %v653_v54, %v2946_v43 }
 0x13d   :  { %v724_v55 = vpack.c.bf16 %v539_v49, %v535_v47  ;;  %v726_v57 = vpack.c.bf16 %v652_v52, %v648_v44 }
 0x13e   :  { %v725_v58 = vpack.c.bf16 %v541_v53, %v537_v17  ;;  %v727_v59 = vpack.c.bf16 %v654_v56, %v650_v48 }
 0x140   :  { %v544_v60 = vpop.f32.mrb[48].mxu0  ;;  %1657 = vmatprep.mubr.bf16.mxu0 %v725_v58  ;;  %v657_v61 = vpop.f32.mrb[48].mxu1  ;;  %1754 = vmatprep.mubr.bf16.mxu1 %v727_v59 }
 0x141   :  { %v546_v62 = vpop.f32.mrb[49].mxu0  ;;  %1658 = vmatmul.mubr.bf16.gmra.mrb[108].mxu0 %v724_v55  ;;  %v658_v63 = vadd.f32 %v657_v61, %v2940_v19  ;;  %v659_v0 = vpop.f32.mrb[49].mxu1  ;;  %1755 = vmatmul.mubr.bf16.gmra.mrb[108].mxu1 %v726_v57  ;;  %v545_v2 = vadd.f32 %v544_v60, %v2943_v42 }
 0x142   :  { %v548_v1 = vpop.f32.mrb[50].mxu0  ;;  %v660_v4 = vadd.f32 %v659_v0, %v2946_v43  ;;  %v661_v6 = vpop.f32.mrb[50].mxu1  ;;  %v547_v8 = vadd.f32 %v546_v62, %v2949_v22 }
 0x143   :  { %v549_v5 = vadd.f32 %v548_v1, %v2943_v42  ;;  %v550_v7 = vpop.f32.mrb[51].mxu0  ;;  %v662_v9 = vadd.f32 %v661_v6, %v2940_v19  ;;  %v663_v11 = vpop.f32.mrb[51].mxu1 }
 0x144   :  { %v551_v10 = vadd.f32 %v550_v7, %v2949_v22  ;;  %v664_v14 = vadd.f32 %v663_v11, %v2946_v43 }
 0x145   :  { %v732_v12 = vpack.c.bf16 %v549_v5, %v545_v2  ;;  %v734_v15 = vpack.c.bf16 %v662_v9, %v658_v63 }
 0x146   :  { %v733_v16 = vpack.c.bf16 %v551_v10, %v547_v8  ;;  %v735_v3 = vpack.c.bf16 %v664_v14, %v660_v4 }
 0x148   :  { %v554_v21 = vpop.f32.mrb[52].mxu0  ;;  %1665 = vmatprep.mubr.bf16.mxu0 %v733_v16  ;;  %v667_v23 = vpop.f32.mrb[52].mxu1  ;;  %1762 = vmatprep.mubr.bf16.mxu1 %v735_v3 }
 0x149   :  { %v556_v24 = vpop.f32.mrb[53].mxu0  ;;  %1666 = vmatmul.mubr.bf16.gmra.mrb[112].mxu0 %v732_v12  ;;  %v668_v25 = vadd.f32 %v667_v23, %v2940_v19  ;;  %v669_v26 = vpop.f32.mrb[53].mxu1  ;;  %1763 = vmatmul.mubr.bf16.gmra.mrb[112].mxu1 %v734_v15  ;;  %v555_v28 = vadd.f32 %v554_v21, %v2943_v42  ;;  %v3018_v23 = vld [vmem:[%s3136_s4] ss:$0 sm:$0xff] }
 0x14a   :  { %v558_v27 = vpop.f32.mrb[54].mxu0  ;;  %v670_v29 = vadd.f32 %v669_v26, %v2946_v43  ;;  %v671_v31 = vpop.f32.mrb[54].mxu1  ;;  %v557_v33 = vadd.f32 %v556_v24, %v2949_v22 }
 0x14b   :  { %v559_v30 = vadd.f32 %v558_v27, %v2943_v42  ;;  %v560_v32 = vpop.f32.mrb[55].mxu0  ;;  %v672_v34 = vadd.f32 %v671_v31, %v2940_v19  ;;  %v673_v36 = vpop.f32.mrb[55].mxu1 }
 0x14c   :  { %v561_v35 = vadd.f32 %v560_v32, %v2949_v22  ;;  %v674_v38 = vadd.f32 %v673_v36, %v2946_v43 }
 0x14d   :  { %v740_v37 = vpack.c.bf16 %v559_v30, %v555_v28  ;;  %v742_v39 = vpack.c.bf16 %v672_v34, %v668_v25 }
 0x14e   :  { %v741_v40 = vpack.c.bf16 %v561_v35, %v557_v33  ;;  %v743_v41 = vpack.c.bf16 %v674_v38, %v670_v29 }
 0x150   :  { %v564_v18 = vpop.f32.mrb[56].mxu0  ;;  %1673 = vmatprep.mubr.bf16.mxu0 %v741_v40  ;;  %v677_v13 = vpop.f32.mrb[56].mxu1  ;;  %1770 = vmatprep.mubr.bf16.mxu1 %v743_v41 }
 0x151   :  { %v566_v20 = vpop.f32.mrb[57].mxu0  ;;  %1674 = vmatmul.mubr.bf16.gmra.mrb[116].mxu0 %v740_v37  ;;  %v678_v44 = vadd.f32 %v677_v13, %v2940_v19  ;;  %v679_v45 = vpop.f32.mrb[57].mxu1  ;;  %1771 = vmatmul.mubr.bf16.gmra.mrb[116].mxu1 %v742_v39  ;;  %v565_v47 = vadd.f32 %v564_v18, %v2943_v42 }
 0x152   :  { %v568_v46 = vpop.f32.mrb[58].mxu0  ;;  %v680_v48 = vadd.f32 %v679_v45, %v2946_v43  ;;  %v681_v50 = vpop.f32.mrb[58].mxu1  ;;  %v567_v17 = vadd.f32 %v566_v20, %v2949_v22 }
 0x153   :  { %v569_v49 = vadd.f32 %v568_v46, %v2943_v42  ;;  %v570_v51 = vpop.f32.mrb[59].mxu0  ;;  %v682_v52 = vadd.f32 %v681_v50, %v2940_v19  ;;  %v683_v54 = vpop.f32.mrb[59].mxu1 }
 0x154   :  { %v571_v53 = vadd.f32 %v570_v51, %v2949_v22  ;;  %v684_v56 = vadd.f32 %v683_v54, %v2946_v43 }
 0x155   :  { %v748_v55 = vpack.c.bf16 %v569_v49, %v565_v47  ;;  %v750_v57 = vpack.c.bf16 %v682_v52, %v678_v44 }
 0x156   :  { %v749_v58 = vpack.c.bf16 %v571_v53, %v567_v17  ;;  %v751_v59 = vpack.c.bf16 %v684_v56, %v680_v48 }
 0x158   :  { %v574_v60 = vpop.f32.mrb[60].mxu0  ;;  %1681 = vmatprep.mubr.bf16.mxu0 %v749_v58  ;;  %v687_v61 = vpop.f32.mrb[60].mxu1  ;;  %1778 = vmatprep.mubr.bf16.mxu1 %v751_v59 }
 0x159   :  { %v576_v62 = vpop.f32.mrb[61].mxu0  ;;  %1682 = vmatmul.mubr.bf16.gmra.mrb[120].mxu0 %v748_v55  ;;  %v688_v63 = vadd.f32 %v687_v61, %v2940_v19  ;;  %v689_v0 = vpop.f32.mrb[61].mxu1  ;;  %1779 = vmatmul.mubr.bf16.gmra.mrb[120].mxu1 %v750_v57  ;;  %v575_v2 = vadd.f32 %v574_v60, %v2943_v42 }
 0x15a   :  { %v578_v1 = vpop.f32.mrb[62].mxu0  ;;  %v690_v4 = vadd.f32 %v689_v0, %v2946_v43  ;;  %v691_v6 = vpop.f32.mrb[62].mxu1  ;;  %v577_v8 = vadd.f32 %v576_v62, %v2949_v22 }
 0x15b   :  { %v579_v5 = vadd.f32 %v578_v1, %v2943_v42  ;;  %v580_v7 = vpop.f32.mrb[63].mxu0  ;;  %v692_v9 = vadd.f32 %v691_v6, %v2940_v19  ;;  %v693_v11 = vpop.f32.mrb[63].mxu1 }
 0x15c   :  { %v581_v10 = vadd.f32 %v580_v7, %v2949_v22  ;;  %v694_v14 = vadd.f32 %v693_v11, %v2946_v43 }
 0x15d   :  { %v756_v12 = vpack.c.bf16 %v579_v5, %v575_v2  ;;  %v758_v15 = vpack.c.bf16 %v692_v9, %v688_v63 }
 0x15e   :  { %v757_v16 = vpack.c.bf16 %v581_v10, %v577_v8  ;;  %v759_v3 = vpack.c.bf16 %v694_v14, %v690_v4 }
 0x160   :  { %1689 = vmatprep.mubr.bf16.mxu0 %v757_v16  ;;  %1786 = vmatprep.mubr.bf16.mxu1 %v759_v3 }
 0x161   :  { %1690 = vmatmul.mubr.bf16.gmra.mrb[124].mxu0 %v756_v12  ;;  %1787 = vmatmul.mubr.bf16.gmra.mrb[124].mxu1 %v758_v15 }
 0x1bc   :  { %v2064_v42 = vpop.f32.mrb[64].mxu0  ;;  %v2128_v21 = vpop.f32.mrb[64].mxu1 }
 0x1bd   :  { %v2065_v19 = vpop.f32.mrb[65].mxu0  ;;  %v2129_v24 = vpop.f32.mrb[65].mxu1 }
 0x1be   :  { %v2066_v22 = vadd.f32 %v2065_v19, %v2064_v42  ;;  %v2067_v25 = vpop.f32.mrb[66].mxu0  ;;  %v2130_v26 = vadd.f32 %v2129_v24, %v2128_v21  ;;  %v2131_v43 = vpop.f32.mrb[66].mxu1 }
 0x1bf   :  { %v2068_v27 = vpop.f32.mrb[67].mxu0  ;;  %v2132_v30 = vpop.f32.mrb[67].mxu1 }
 0x1c0   :  { %v1442_v28 = vadd.f32 %v2066_v22, %v3018_v23  ;;  %v2069_v29 = vadd.f32 %v2068_v27, %v2067_v25  ;;  %v2133_v31 = vadd.f32 %v2132_v30, %v2131_v43 }
 0x1c2   :  { %v3021_v32 = vadd.f32 %v2130_v26, %v1442_v28  ;;  %v1445_v33 = vadd.f32 %v2069_v29, %v3018_v23 }
 0x1c4   :  { %v3024_v34 = vadd.f32 %v2133_v31, %v1445_v33  ;;  %v2070_v35 = vpop.f32.mrb[68].mxu0  ;;  %v2134_v36 = vpop.f32.mrb[68].mxu1 }
 0x1c5   :  { %v2071_v37 = vpop.f32.mrb[69].mxu0  ;;  %v2135_v39 = vpop.f32.mrb[69].mxu1 }
 0x1c6   :  { %v2072_v38 = vadd.f32 %v2071_v37, %v2070_v35  ;;  %v2073_v40 = vpop.f32.mrb[70].mxu0  ;;  %v2136_v41 = vadd.f32 %v2135_v39, %v2134_v36  ;;  %v2137_v18 = vpop.f32.mrb[70].mxu1 }
 0x1c7   :  { %v2074_v13 = vpop.f32.mrb[71].mxu0  ;;  %v2138_v45 = vpop.f32.mrb[71].mxu1 }
 0x1c8   :  { %v1450_v20 = vadd.f32 %v2072_v38, %v3018_v23  ;;  %v2075_v44 = vadd.f32 %v2074_v13, %v2073_v40  ;;  %v2139_v46 = vadd.f32 %v2138_v45, %v2137_v18 }
 0x1ca   :  { %v3027_v47 = vadd.f32 %v2136_v41, %v1450_v20  ;;  %v1453_v48 = vadd.f32 %v2075_v44, %v3018_v23 }
 0x1cc   :  { %v3030_v49 = vadd.f32 %v2139_v46, %v1453_v48  ;;  %v2076_v50 = vpop.f32.mrb[72].mxu0  ;;  %v2140_v51 = vpop.f32.mrb[72].mxu1 }
 0x1cd   :  { %v2077_v17 = vpop.f32.mrb[73].mxu0  ;;  %v2141_v53 = vpop.f32.mrb[73].mxu1 }
 0x1ce   :  { %v2078_v52 = vadd.f32 %v2077_v17, %v2076_v50  ;;  %v2079_v54 = vpop.f32.mrb[74].mxu0  ;;  %v2142_v55 = vadd.f32 %v2141_v53, %v2140_v51  ;;  %v2143_v56 = vpop.f32.mrb[74].mxu1 }
 0x1cf   :  { %v2080_v57 = vpop.f32.mrb[75].mxu0  ;;  %v2144_v60 = vpop.f32.mrb[75].mxu1 }
 0x1d0   :  { %v1458_v58 = vadd.f32 %v2078_v52, %v3018_v23  ;;  %v2081_v59 = vadd.f32 %v2080_v57, %v2079_v54  ;;  %v2145_v61 = vadd.f32 %v2144_v60, %v2143_v56 }
 0x1d2   :  { %v3033_v62 = vadd.f32 %v2142_v55, %v1458_v58  ;;  %v1461_v63 = vadd.f32 %v2081_v59, %v3018_v23 }
 0x1d4   :  { %v3036_v0 = vadd.f32 %v2145_v61, %v1461_v63  ;;  %v2082_v1 = vpop.f32.mrb[76].mxu0  ;;  %v2146_v2 = vpop.f32.mrb[76].mxu1 }
 0x1d5   :  { %v2083_v4 = vpop.f32.mrb[77].mxu0  ;;  %v2147_v6 = vpop.f32.mrb[77].mxu1 }
 0x1d6   :  { %v2084_v5 = vadd.f32 %v2083_v4, %v2082_v1  ;;  %v2085_v7 = vpop.f32.mrb[78].mxu0  ;;  %v2148_v8 = vadd.f32 %v2147_v6, %v2146_v2  ;;  %v2149_v9 = vpop.f32.mrb[78].mxu1 }
 0x1d7   :  { %v2086_v10 = vpop.f32.mrb[79].mxu0  ;;  %v2150_v14 = vpop.f32.mrb[79].mxu1 }
 0x1d8   :  { %v1466_v11 = vadd.f32 %v2084_v5, %v3018_v23  ;;  %v2087_v12 = vadd.f32 %v2086_v10, %v2085_v7  ;;  %v2151_v15 = vadd.f32 %v2150_v14, %v2149_v9 }
 0x1da   :  { %v3039_v16 = vadd.f32 %v2148_v8, %v1466_v11  ;;  %v1469_v3 = vadd.f32 %v2087_v12, %v3018_v23 }
 0x1dc   :  { %v3042_v42 = vadd.f32 %v2151_v15, %v1469_v3  ;;  %v2088_v21 = vpop.f32.mrb[80].mxu0  ;;  %v2152_v19 = vpop.f32.mrb[80].mxu1 }
 0x1dd   :  { %v2089_v22 = vpop.f32.mrb[81].mxu0  ;;  %v2153_v25 = vpop.f32.mrb[81].mxu1 }
 0x1de   :  { %v2090_v24 = vadd.f32 %v2089_v22, %v2088_v21  ;;  %v2091_v26 = vpop.f32.mrb[82].mxu0  ;;  %v2154_v43 = vadd.f32 %v2153_v25, %v2152_v19  ;;  %v2155_v27 = vpop.f32.mrb[82].mxu1 }
 0x1df   :  { %v2092_v28 = vpop.f32.mrb[83].mxu0  ;;  %v2156_v31 = vpop.f32.mrb[83].mxu1 }
 0x1e0   :  { %v1474_v29 = vadd.f32 %v2090_v24, %v3018_v23  ;;  %v2093_v30 = vadd.f32 %v2092_v28, %v2091_v26  ;;  %v2157_v33 = vadd.f32 %v2156_v31, %v2155_v27 }
 0x1e2   :  { %v3045_v35 = vadd.f32 %v2154_v43, %v1474_v29  ;;  %v1477_v36 = vadd.f32 %v2093_v30, %v3018_v23 }
 0x1e4   :  { %v3048_v37 = vadd.f32 %v2157_v33, %v1477_v36  ;;  %v2094_v38 = vpop.f32.mrb[84].mxu0  ;;  %v2158_v39 = vpop.f32.mrb[84].mxu1 }
 0x1e5   :  { %v2095_v40 = vpop.f32.mrb[85].mxu0  ;;  %v2159_v18 = vpop.f32.mrb[85].mxu1 }
 0x1e6   :  { %v2096_v41 = vadd.f32 %v2095_v40, %v2094_v38  ;;  %v2097_v13 = vpop.f32.mrb[86].mxu0  ;;  %v2160_v20 = vadd.f32 %v2159_v18, %v2158_v39  ;;  %v2161_v44 = vpop.f32.mrb[86].mxu1 }
 0x1e7   :  { %v2098_v45 = vpop.f32.mrb[87].mxu0  ;;  %v2162_v50 = vpop.f32.mrb[87].mxu1 }
 0x1e8   :  { %v1482_v46 = vadd.f32 %v2096_v41, %v3018_v23  ;;  %v2099_v48 = vadd.f32 %v2098_v45, %v2097_v13  ;;  %v2163_v51 = vadd.f32 %v2162_v50, %v2161_v44 }
 0x1ea   :  { %v3051_v17 = vadd.f32 %v2160_v20, %v1482_v46  ;;  %v1485_v52 = vadd.f32 %v2099_v48, %v3018_v23 }
 0x1ec   :  { %v3054_v53 = vadd.f32 %v2163_v51, %v1485_v52  ;;  %v2100_v54 = vpop.f32.mrb[88].mxu0  ;;  %v2164_v55 = vpop.f32.mrb[88].mxu1 }
 0x1ed   :  { %v2101_v56 = vpop.f32.mrb[89].mxu0  ;;  %v2165_v58 = vpop.f32.mrb[89].mxu1 }
 0x1ee   :  { %v2102_v57 = vadd.f32 %v2101_v56, %v2100_v54  ;;  %v2103_v59 = vpop.f32.mrb[90].mxu0  ;;  %v2166_v60 = vadd.f32 %v2165_v58, %v2164_v55  ;;  %v2167_v61 = vpop.f32.mrb[90].mxu1 }
 0x1ef   :  { %v2104_v63 = vpop.f32.mrb[91].mxu0  ;;  %v2168_v4 = vpop.f32.mrb[91].mxu1 }
 0x1f0   :  { %v1490_v1 = vadd.f32 %v2102_v57, %v3018_v23  ;;  %v2105_v2 = vadd.f32 %v2104_v63, %v2103_v59  ;;  %v2169_v5 = vadd.f32 %v2168_v4, %v2167_v61 }
 0x1f2   :  { %v3057_v6 = vadd.f32 %v2166_v60, %v1490_v1  ;;  %v1493_v7 = vadd.f32 %v2105_v2, %v3018_v23 }
 0x1f4   :  { %v3060_v8 = vadd.f32 %v2169_v5, %v1493_v7  ;;  %v2106_v9 = vpop.f32.mrb[92].mxu0  ;;  %v2170_v10 = vpop.f32.mrb[92].mxu1 }
 0x1f5   :  { %v2107_v11 = vpop.f32.mrb[93].mxu0  ;;  %v2171_v14 = vpop.f32.mrb[93].mxu1 }
 0x1f6   :  { %v2108_v12 = vadd.f32 %v2107_v11, %v2106_v9  ;;  %v2109_v15 = vpop.f32.mrb[94].mxu0  ;;  %v2172_v3 = vadd.f32 %v2171_v14, %v2170_v10  ;;  %v2173_v21 = vpop.f32.mrb[94].mxu1 }
 0x1f7   :  { %v2110_v19 = vpop.f32.mrb[95].mxu0  ;;  %v2174_v25 = vpop.f32.mrb[95].mxu1 }
 0x1f8   :  { %v1498_v22 = vadd.f32 %v2108_v12, %v3018_v23  ;;  %v2111_v24 = vadd.f32 %v2110_v19, %v2109_v15  ;;  %v2175_v26 = vadd.f32 %v2174_v25, %v2173_v21 }
 0x1fa   :  { %v3063_v43 = vadd.f32 %v2172_v3, %v1498_v22  ;;  %v1501_v27 = vadd.f32 %v2111_v24, %v3018_v23 }
 0x1fc   :  { %v3066_v28 = vadd.f32 %v2175_v26, %v1501_v27  ;;  %v2192_v29 = vpop.f32.mrb[96].mxu0  ;;  %v2256_v30 = vpop.f32.mrb[96].mxu1 }
 0x1fd   :  { %v2193_v31 = vpop.f32.mrb[97].mxu0  ;;  %v2257_v36 = vpop.f32.mrb[97].mxu1 }
 0x1fe   :  { %v2194_v33 = vadd.f32 %v2193_v31, %v2192_v29  ;;  %v2195_v38 = vpop.f32.mrb[98].mxu0  ;;  %v2258_v39 = vadd.f32 %v2257_v36, %v2256_v30  ;;  %v2259_v40 = vpop.f32.mrb[98].mxu1 }
 0x1ff   :  { %v2196_v41 = vpop.f32.mrb[99].mxu0  ;;  %v2260_v20 = vpop.f32.mrb[99].mxu1 }
 0x200   :  { %v1636_v18 = vadd.f32 %v2194_v33, %v3021_v32  ;;  %v2197_v13 = vadd.f32 %v2196_v41, %v2195_v38  ;;  %v2261_v44 = vadd.f32 %v2260_v20, %v2259_v40 }
 0x202   :  { %v1733_v45 = vadd.f32 %v2258_v39, %v1636_v18  ;;  %v1639_v46 = vadd.f32 %v2197_v13, %v3024_v34 }
 0x204   :  { %v2032_v23 = vmul.f32 -1.442695, %v1733_v45  ;;  %v1736_v48 = vadd.f32 %v2261_v44, %v1639_v46  ;;  %v2198_v50 = vpop.f32.mrb[100].mxu0  ;;  %v2262_v51 = vpop.f32.mrb[100].mxu1 }
 0x205   :  { %v2199_v52 = vpop.f32.mrb[101].mxu0  ;;  %v2263_v56 = vpop.f32.mrb[101].mxu1 }
 0x206   :  { %2377 = vpow2.f32 %v2032_v23  ;;  %v2033_v54 = vmul.f32 -1.442695, %v1736_v48  ;;  %v2200_v55 = vadd.f32 %v2199_v52, %v2198_v50  ;;  %v2201_v57 = vpop.f32.mrb[102].mxu0  ;;  %v2264_v58 = vadd.f32 %v2263_v56, %v2262_v51  ;;  %v2265_v59 = vpop.f32.mrb[102].mxu1 }
 0x207   :  { %v2202_v60 = vpop.f32.mrb[103].mxu0  ;;  %v2266_v63 = vpop.f32.mrb[103].mxu1 }
 0x208   :  { %2379 = vpow2.f32 %v2033_v54  ;;  %v1644_v32 = vadd.f32 %v2200_v55, %v3027_v47  ;;  %v2203_v61 = vadd.f32 %v2202_v60, %v2201_v57  ;;  %v2267_v1 = vadd.f32 %v2266_v63, %v2265_v59 }
 0x20a   :  { %v1741_v34 = vadd.f32 %v2264_v58, %v1644_v32  ;;  %v1647_v2 = vadd.f32 %v2203_v61, %v3030_v49 }
 0x20c   :  { %v2034_v4 = vmul.f32 -1.442695, %v1741_v34  ;;  %v1744_v5 = vadd.f32 %v2267_v1, %v1647_v2  ;;  %v2204_v7 = vpop.f32.mrb[104].mxu0  ;;  %v2268_v9 = vpop.f32.mrb[104].mxu1 }
 0x20d   :  { %v2205_v10 = vpop.f32.mrb[105].mxu0  ;;  %v2269_v14 = vpop.f32.mrb[105].mxu1 }
 0x20e   :  { %2381 = vpow2.f32 %v2034_v4  ;;  %v2035_v11 = vmul.f32 -1.442695, %v1744_v5  ;;  %v2206_v12 = vadd.f32 %v2205_v10, %v2204_v7  ;;  %v2207_v15 = vpop.f32.mrb[106].mxu0  ;;  %v2270_v3 = vadd.f32 %v2269_v14, %v2268_v9  ;;  %v2271_v21 = vpop.f32.mrb[106].mxu1 }
 0x20f   :  { %v2208_v19 = vpop.f32.mrb[107].mxu0  ;;  %v2272_v25 = vpop.f32.mrb[107].mxu1 }
 0x210   :  { %v2378_v47 = vpop.eup %2377  ;;  %2383 = vpow2.f32 %v2035_v11  ;;  %v1652_v22 = vadd.f32 %v2206_v12, %v3033_v62  ;;  %v2209_v24 = vadd.f32 %v2208_v19, %v2207_v15  ;;  %v2273_v26 = vadd.f32 %v2272_v25, %v2271_v21 }
 0x211   :  { %v1843_v49 = vadd.f32 1.0, %v2378_v47 }
 0x212   :  { %v2380_v27 = vpop.eup %2379  ;;  %v1749_v29 = vadd.f32 %v2270_v3, %v1652_v22  ;;  %v1655_v30 = vadd.f32 %v2209_v24, %v3036_v0 }
 0x213   :  { %2385 = vrcp.f32 %v1843_v49  ;;  %v1844_v31 = vadd.f32 1.0, %v2380_v27 }
 0x214   :  { %v2036_v33 = vmul.f32 -1.442695, %v1749_v29  ;;  %v1752_v36 = vadd.f32 %v2273_v26, %v1655_v30  ;;  %v2210_v38 = vpop.f32.mrb[108].mxu0  ;;  %v2274_v39 = vpop.f32.mrb[108].mxu1 }
 0x215   :  { %2387 = vrcp.f32 %v1844_v31  ;;  %v2211_v40 = vpop.f32.mrb[109].mxu0  ;;  %v2275_v62 = vpop.f32.mrb[109].mxu1 }
 0x216   :  { %2389 = vpow2.f32 %v2036_v33  ;;  %v2037_v41 = vmul.f32 -1.442695, %v1752_v36  ;;  %v2212_v18 = vadd.f32 %v2211_v40, %v2210_v38  ;;  %v2213_v13 = vpop.f32.mrb[110].mxu0  ;;  %v2276_v20 = vadd.f32 %v2275_v62, %v2274_v39  ;;  %v2277_v44 = vpop.f32.mrb[110].mxu1 }
 0x217   :  { %v2214_v45 = vpop.f32.mrb[111].mxu0  ;;  %v2278_v48 = vpop.f32.mrb[111].mxu1 }
 0x218   :  { %v2382_v46 = vpop.eup %2381  ;;  %2391 = vpow2.f32 %v2037_v41  ;;  %v1660_v0 = vadd.f32 %v2212_v18, %v3039_v16  ;;  %v2215_v23 = vadd.f32 %v2214_v45, %v2213_v13  ;;  %v2279_v51 = vadd.f32 %v2278_v48, %v2277_v44 }
 0x219   :  { %v1845_v50 = vadd.f32 1.0, %v2382_v46 }
 0x21a   :  { %v2384_v52 = vpop.eup %2383  ;;  %v1757_v54 = vadd.f32 %v2276_v20, %v1660_v0  ;;  %v1663_v55 = vadd.f32 %v2215_v23, %v3042_v42 }
 0x21b   :  { %2393 = vrcp.f32 %v1845_v50  ;;  %v1846_v56 = vadd.f32 1.0, %v2384_v52 }
 0x21c   :  { %v2038_v57 = vmul.f32 -1.442695, %v1757_v54  ;;  %v1760_v58 = vadd.f32 %v2279_v51, %v1663_v55  ;;  %v2216_v59 = vpop.f32.mrb[112].mxu0  ;;  %v2280_v32 = vpop.f32.mrb[112].mxu1 }
 0x21d   :  { %v2386_v60 = vpop.eup %2385  ;;  %2395 = vrcp.f32 %v1846_v56  ;;  %v2217_v61 = vpop.f32.mrb[113].mxu0 }
 0x21e   :  { %1891 = vst [vmem:[%s3137_s5] sm:$0xff] %v2386_v60  ;;  %2397 = vpow2.f32 %v2038_v57  ;;  %v2039_v16 = vmul.f32 -1.442695, %v1760_v58  ;;  %v2218_v63 = vadd.f32 %v2217_v61, %v2216_v59  ;;  %v2281_v1 = vpop.f32.mrb[113].mxu1  ;;  %v2219_v34 = vpop.f32.mrb[114].mxu0 }
 0x21f   :  { %v2388_v2 = vpop.eup %2387  ;;  %v2282_v42 = vadd.f32 %v2281_v1, %v2280_v32  ;;  %v2283_v4 = vpop.f32.mrb[114].mxu1 }
 0x220   :  { %v2220_v5 = vpop.f32.mrb[115].mxu0  ;;  %v2390_v7 = vpop.eup %2389  ;;  %1892 = vst [vmem:[%s3137_s5 + $0x8] sm:$0xff] %v2388_v2  ;;  %2399 = vpow2.f32 %v2039_v16  ;;  %v1668_v9 = vadd.f32 %v2218_v63, %v3045_v35 }
 0x221   :  { %v2221_v10 = vadd.f32 %v2220_v5, %v2219_v34  ;;  %v2284_v11 = vpop.f32.mrb[115].mxu1  ;;  %v1847_v12 = vadd.f32 1.0, %v2390_v7 }
 0x222   :  { %v2285_v14 = vadd.f32 %v2284_v11, %v2283_v4  ;;  %v2392_v15 = vpop.eup %2391  ;;  %v1765_v3 = vadd.f32 %v2282_v42, %v1668_v9 }
 0x223   :  { %v1671_v21 = vadd.f32 %v2221_v10, %v3048_v37  ;;  %2401 = vrcp.f32 %v1847_v12  ;;  %v1848_v19 = vadd.f32 1.0, %v2392_v15 }
 0x224   :  { %v2040_v47 = vmul.f32 -1.442695, %v1765_v3  ;;  %v2222_v24 = vpop.f32.mrb[116].mxu0  ;;  %v2286_v49 = vpop.f32.mrb[116].mxu1 }
 0x225   :  { %v1768_v22 = vadd.f32 %v2285_v14, %v1671_v21  ;;  %v2394_v25 = vpop.eup %2393  ;;  %2403 = vrcp.f32 %v1848_v19  ;;  %v2223_v26 = vpop.f32.mrb[117].mxu0 }
 0x226   :  { %1893 = vst [vmem:[%s3137_s5 + $0x10] sm:$0xff] %v2394_v25  ;;  %2405 = vpow2.f32 %v2040_v47  ;;  %v2224_v27 = vadd.f32 %v2223_v26, %v2222_v24  ;;  %v2287_v29 = vpop.f32.mrb[117].mxu1  ;;  %v2225_v30 = vpop.f32.mrb[118].mxu0 }
 0x227   :  { %v2041_v35 = vmul.f32 -1.442695, %v1768_v22  ;;  %v2396_v31 = vpop.eup %2395  ;;  %v2288_v37 = vadd.f32 %v2287_v29, %v2286_v49  ;;  %v2289_v33 = vpop.f32.mrb[118].mxu1 }
 0x228   :  { %v2226_v36 = vpop.f32.mrb[119].mxu0  ;;  %v2398_v38 = vpop.eup %2397  ;;  %1894 = vst [vmem:[%s3137_s5 + $0x18] sm:$0xff] %v2396_v31  ;;  %v1676_v39 = vadd.f32 %v2224_v27, %v3051_v17 }
 0x229   :  { %2407 = vpow2.f32 %v2041_v35  ;;  %v2227_v40 = vadd.f32 %v2226_v36, %v2225_v30  ;;  %v2290_v41 = vpop.f32.mrb[119].mxu1  ;;  %v1849_v18 = vadd.f32 1.0, %v2398_v38 }
 0x22a   :  { %v2291_v62 = vadd.f32 %v2290_v41, %v2289_v33  ;;  %v2400_v13 = vpop.eup %2399  ;;  %v1773_v20 = vadd.f32 %v2288_v37, %v1676_v39 }
 0x22b   :  { %v1679_v44 = vadd.f32 %v2227_v40, %v3054_v53  ;;  %2409 = vrcp.f32 %v1849_v18  ;;  %v1850_v45 = vadd.f32 1.0, %v2400_v13 }
 0x22c   :  { %v2042_v46 = vmul.f32 -1.442695, %v1773_v20  ;;  %v2228_v23 = vpop.f32.mrb[120].mxu0  ;;  %v2292_v50 = vpop.f32.mrb[120].mxu1 }
 0x22d   :  { %v1776_v0 = vadd.f32 %v2291_v62, %v1679_v44  ;;  %v2402_v48 = vpop.eup %2401  ;;  %2411 = vrcp.f32 %v1850_v45  ;;  %v2229_v51 = vpop.f32.mrb[121].mxu0 }
 0x22e   :  { %1895 = vst [vmem:[%s3137_s5 + $0x20] sm:$0xff] %v2402_v48  ;;  %2413 = vpow2.f32 %v2042_v46  ;;  %v2230_v52 = vadd.f32 %v2229_v51, %v2228_v23  ;;  %v2293_v54 = vpop.f32.mrb[121].mxu1  ;;  %v2231_v55 = vpop.f32.mrb[122].mxu0 }
 0x22f   :  { %v2043_v17 = vmul.f32 -1.442695, %v1776_v0  ;;  %v2404_v56 = vpop.eup %2403  ;;  %v2294_v53 = vadd.f32 %v2293_v54, %v2292_v50  ;;  %v2295_v57 = vpop.f32.mrb[122].mxu1 }
 0x230   :  { %v2232_v58 = vpop.f32.mrb[123].mxu0  ;;  %v2406_v59 = vpop.eup %2405  ;;  %1896 = vst [vmem:[%s3137_s5 + $0x28] sm:$0xff] %v2404_v56  ;;  %v1684_v60 = vadd.f32 %v2230_v52, %v3057_v6 }
 0x231   :  { %2415 = vpow2.f32 %v2043_v17  ;;  %v2233_v32 = vadd.f32 %v2232_v58, %v2231_v55  ;;  %v2296_v61 = vpop.f32.mrb[123].mxu1  ;;  %v1851_v16 = vadd.f32 1.0, %v2406_v59 }
 0x232   :  { %v2297_v63 = vadd.f32 %v2296_v61, %v2295_v57  ;;  %v1781_v34 = vadd.f32 %v2294_v53, %v1684_v60 }
 0x233   :  { %v2408_v1 = vpop.eup %2407  ;;  %v1687_v2 = vadd.f32 %v2233_v32, %v3060_v8  ;;  %2417 = vrcp.f32 %v1851_v16 }
 0x234   :  { %v1852_v42 = vadd.f32 1.0, %v2408_v1  ;;  %v2044_v4 = vmul.f32 -1.442695, %v1781_v34  ;;  %v2234_v7 = vpop.f32.mrb[124].mxu0  ;;  %v2298_v10 = vpop.f32.mrb[124].mxu1 }
 0x235   :  { %v1784_v5 = vadd.f32 %v2297_v63, %v1687_v2  ;;  %v2410_v9 = vpop.eup %2409  ;;  %v2235_v11 = vpop.f32.mrb[125].mxu0 }
 0x236   :  { %2419 = vrcp.f32 %v1852_v42  ;;  %1897 = vst [vmem:[%s3137_s5 + $0x30] sm:$0xff] %v2410_v9  ;;  %v2236_v12 = vadd.f32 %v2235_v11, %v2234_v7  ;;  %v2299_v14 = vpop.f32.mrb[125].mxu1  ;;  %v2237_v15 = vpop.f32.mrb[126].mxu0 }
 0x237   :  { %2421 = vpow2.f32 %v2044_v4  ;;  %v2045_v6 = vmul.f32 -1.442695, %v1784_v5  ;;  %v2412_v3 = vpop.eup %2411  ;;  %v2300_v8 = vadd.f32 %v2299_v14, %v2298_v10  ;;  %v2301_v21 = vpop.f32.mrb[126].mxu1 }
 0x238   :  { %v2238_v19 = vpop.f32.mrb[127].mxu0  ;;  %v2414_v47 = vpop.eup %2413  ;;  %1898 = vst [vmem:[%s3137_s5 + $0x38] sm:$0xff] %v2412_v3  ;;  %v1692_v22 = vadd.f32 %v2236_v12, %v3063_v43 }
 0x239   :  { %2423 = vpow2.f32 %v2045_v6  ;;  %v2239_v24 = vadd.f32 %v2238_v19, %v2237_v15  ;;  %v2302_v25 = vpop.f32.mrb[127].mxu1  ;;  %v1853_v49 = vadd.f32 1.0, %v2414_v47 }
 0x23a   :  { %v2303_v26 = vadd.f32 %v2302_v25, %v2301_v21  ;;  %v1789_v27 = vadd.f32 %v2300_v8, %v1692_v22 }
 0x23b   :  { %v2416_v35 = vpop.eup %2415  ;;  %v1695_v29 = vadd.f32 %v2239_v24, %v3066_v28  ;;  %2425 = vrcp.f32 %v1853_v49 }
 0x23c   :  { %v1854_v30 = vadd.f32 1.0, %v2416_v35  ;;  %v2046_v31 = vmul.f32 -1.442695, %v1789_v27 }
 0x23d   :  { %v1792_v37 = vadd.f32 %v2303_v26, %v1695_v29  ;;  %v2418_v33 = vpop.eup %2417 }
 0x23e   :  { %2427 = vrcp.f32 %v1854_v30  ;;  %1899 = vst [vmem:[%s3137_s5 + $0x40] sm:$0xff] %v2418_v33 }
 0x23f   :  { %2429 = vpow2.f32 %v2046_v31  ;;  %v2047_v43 = vmul.f32 -1.442695, %v1792_v37 }
 0x240   :  { %v2420_v36 = vpop.eup %2419 }
 0x241   :  { %v2422_v38 = vpop.eup %2421  ;;  %1900 = vst [vmem:[%s3137_s5 + $0x48] sm:$0xff] %v2420_v36  ;;  %2431 = vpow2.f32 %v2047_v43 }
 0x242   :  { %v1855_v28 = vadd.f32 1.0, %v2422_v38 }
 0x243   :  { %v2424_v39 = vpop.eup %2423 }
 0x244   :  { %2433 = vrcp.f32 %v1855_v28  ;;  %v1856_v40 = vadd.f32 1.0, %v2424_v39 }
 0x245   :  { %v2426_v41 = vpop.eup %2425 }
 0x246   :  { %2435 = vrcp.f32 %v1856_v40  ;;  %1901 = vst [vmem:[%s3137_s5 + $0x50] sm:$0xff] %v2426_v41 }
 0x248   :  { %v2428_v18 = vpop.eup %2427 }
 0x249   :  { %v2430_v62 = vpop.eup %2429  ;;  %1902 = vst [vmem:[%s3137_s5 + $0x58] sm:$0xff] %v2428_v18 }
 0x24a   :  { %v1857_v13 = vadd.f32 1.0, %v2430_v62 }
 0x24b   :  { %v2432_v20 = vpop.eup %2431 }
 0x24c   :  { %2437 = vrcp.f32 %v1857_v13  ;;  %v1858_v44 = vadd.f32 1.0, %v2432_v20 }
 0x24e   :  { %v2434_v45 = vpop.eup %2433  ;;  %2439 = vrcp.f32 %v1858_v44 }
 0x24f   :  { %1903 = vst [vmem:[%s3137_s5 + $0x60] sm:$0xff] %v2434_v45 }
 0x250   :  { %v2436_v46 = vpop.eup %2435 }
 0x251   :  { %1904 = vst [vmem:[%s3137_s5 + $0x68] sm:$0xff] %v2436_v46 }
 0x256   :  { %v2438_v0 = vpop.eup %2437 }
 0x257   :  { %1905 = vst [vmem:[%s3137_s5 + $0x70] sm:$0xff] %v2438_v0 }
 0x258   :  { %v2440_v23 = vpop.eup %2439 }
 0x259   :  { %1906 = vst [vmem:[%s3137_s5 + $0x78] sm:$0xff] %v2440_v23 }

</bundles_post_ra>
